<compile_context>
chip_gen: v7x
topology: tpu7x:2x2x1
jax: 0.10.0
libtpu: 0.0.40
codegen_flags: <defaults>
</compile_context>

<pallas_src>
import functools

import numpy as np

import jax
import jax.numpy as jnp
from jax import lax
from jax.experimental import pallas as pl
from jax.experimental.pallas import tpu as pltpu


# --------------------------------------------------------------------------
# Activation
# --------------------------------------------------------------------------
def _scaled_tanh(x):
    return 1.7159 * jnp.tanh((2.0 / 3.0) * x)


# --------------------------------------------------------------------------
# The single fused LeNet5 kernel
# --------------------------------------------------------------------------
def _lenet5_kernel(x_ref, t1_ref, b1_ref, sv1_ref, sh1_ref,
                   t3_ref, b3_ref, sv2_ref, sh2_ref,
                   w5_ref, b5_ref, w6_ref, b6_ref, wo_ref, bo_ref,
                   out_ref, p1_ref, p2_ref, *, batch):
    f32 = jnp.float32
    dot = functools.partial(jnp.dot, preferred_element_type=f32)

    # ---- C1: 5x5 conv (1 -> 6) on 32x32, as 5 vertical-tap GEMMs -----------
    # x_ref:  (B*32, 32)  rows = (b, h), lanes = w
    # t1_ref: (5*32, 168) per-tap Toeplitz band matrices, cols = co*28 + wo
    r1 = batch * 32 - 4                       # rows with all 5 taps in range
    a1 = dot(x_ref[pl.ds(0, r1), :], t1_ref[pl.ds(0, 32), :])
    for ki in range(1, 5):
        a1 = a1 + dot(x_ref[pl.ds(ki, r1), :], t1_ref[pl.ds(ki * 32, 32), :])
    a1 = _scaled_tanh(a1 + b1_ref[...])       # (r1, 168)

    # ---- S2: 2x2 avg pool as two small GEMMs (vertical, then horizontal) ---
    p1_ref[...] = dot(dot(sv1_ref[...], a1), sh1_ref[...])   # (B*14, 6*14)

    # ---- C3: 5x5 conv (6 -> 16) on 14x14, same Toeplitz scheme -------------
    # t3_ref: (5*84, 160)  rows = ki*84 + ci*14 + w, cols = co*10 + wo
    r2 = batch * 14 - 4
    a2 = dot(p1_ref[pl.ds(0, r2), :], t3_ref[pl.ds(0, 84), :])
    for ki in range(1, 5):
        a2 = a2 + dot(p1_ref[pl.ds(ki, r2), :], t3_ref[pl.ds(ki * 84, 84), :])
    a2 = _scaled_tanh(a2 + b3_ref[...])       # (r2, 160)

    # ---- S4: 2x2 avg pool ---------------------------------------------------
    p2_ref[...] = dot(dot(sv2_ref[...], a2), sh2_ref[...])   # (B*5, 16*5)

    # ---- C5 / F6 / output: fully connected stack, per image ----------------
    for b in range(batch):
        acc = b5_ref[...]                                     # (1, 120)
        for h in range(5):                                    # spatial rows
            acc = acc + dot(p2_ref[pl.ds(b * 5 + h, 1), :],
                            w5_ref[pl.ds(h * 80, 80), :])
        h5 = _scaled_tanh(acc)                                # (1, 120)
        h6 = _scaled_tanh(dot(h5, w6_ref[...]) + b6_ref[...])  # (1, 84)
        out_ref[pl.ds(b, 1), :] = dot(h6, wo_ref[...]) + bo_ref[...]


# --------------------------------------------------------------------------
# One-time parameter re-layout (NOT done per forward call)
# --------------------------------------------------------------------------
def prepare_params(params):
    f32 = jnp.float32
    KW = 5

    # C1: Toeplitz band matrices, one per vertical tap ki.
    #   t1[ki*32 + w, co*28 + wo] = W1[co, 0, ki, w - wo]  (0 <= w-wo <= 4)
    w1t = jnp.asarray(params["C1_w"], f32).transpose(2, 3, 1, 0)[:, :, 0, :]
    ind1 = np.zeros((KW, 32, 28), np.float32)
    for kj in range(KW):
        for wo in range(28):
            ind1[kj, wo + kj, wo] = 1.0
    t1 = jnp.einsum("kjc,jwv->kwcv", w1t, jnp.asarray(ind1))
    t1 = t1.reshape(5 * 32, 6 * 28)

    # C3: t3[ki*84 + ci*14 + w, co*10 + wo] = W3[co, ci, ki, w - wo]
    w3t = jnp.asarray(params["C3_w"], f32).transpose(2, 3, 1, 0)
    ind3 = np.zeros((KW, 14, 10), np.float32)
    for kj in range(KW):
        for wo in range(10):
            ind3[kj, wo + kj, wo] = 1.0
    t3 = jnp.einsum("kjco,jwv->kcwov", w3t, jnp.asarray(ind3))
    t3 = t3.reshape(5 * 6 * 14, 16 * 10)

    # Biases expanded to the lane layouts used in the kernel.
    b1 = jnp.repeat(jnp.asarray(params["C1_b"], f32), 28).reshape(1, 6 * 28)
    b3 = jnp.repeat(jnp.asarray(params["C3_b"], f32), 10).reshape(1, 16 * 10)

    # C5: reorder input features from torch's (c, h, w) to kernel (h, c, w).
    w5 = jnp.asarray(params["C5_w"], f32).reshape(120, 16, 5, 5)
    w5 = w5.transpose(2, 1, 3, 0).reshape(400, 120)   # rows = h*80 + c*5 + w
    b5 = jnp.asarray(params["C5_b"], f32).reshape(1, 120)

    w6 = jnp.asarray(params["F6_w"], f32).T           # (120, 84)
    b6 = jnp.asarray(params["F6_b"], f32).reshape(1, 84)
    wo = jnp.asarray(params["out_w"], f32).T          # (84, 10)
    bo = jnp.asarray(params["out_b"], f32).reshape(1, 10)

    return {"t1": t1, "b1": b1, "t3": t3, "b3": b3,
            "w5": w5, "b5": b5, "w6": w6, "b6": b6, "wo": wo, "bo": bo}


def _pool_matrices(batch):
    """Constant selector matrices implementing the two 2x2 avg pools as GEMMs."""
    # S2 vertical pair-sum (includes the 0.25 factor), block-diagonal over b.
    r1 = batch * 32 - 4
    sv1 = np.zeros((batch * 14, r1), np.float32)
    for b in range(batch):
        for h2 in range(14):
            for dh in range(2):
                sv1[b * 14 + h2, b * 32 + 2 * h2 + dh] = 0.25
    # S2 horizontal pair-sum + stride-2 decimation, per channel block.
    sh1 = np.zeros((6 * 28, 6 * 14), np.float32)
    for c in range(6):
        for w in range(28):
            sh1[c * 28 + w, c * 14 + w // 2] = 1.0
    # S4 counterparts.
    r2 = batch * 14 - 4
    sv2 = np.zeros((batch * 5, r2), np.float32)
    for b in range(batch):
        for h4 in range(5):
            for dh in range(2):
                sv2[b * 5 + h4, b * 14 + 2 * h4 + dh] = 0.25
    sh2 = np.zeros((16 * 10, 16 * 5), np.float32)
    for c in range(16):
        for w in range(10):
            sh2[c * 10 + w, c * 5 + w // 2] = 1.0
    return (jnp.asarray(sv1), jnp.asarray(sh1),
            jnp.asarray(sv2), jnp.asarray(sh2))


# --------------------------------------------------------------------------
# Forward pass: a single fused pallas_call
# --------------------------------------------------------------------------
def lenet5_forward(prep, x):
    batch = x.shape[0]
    assert x.shape[1:] == (1, 32, 32), x.shape
    x2 = x.reshape(batch * 32, 32)                     # rows = (b, h), lanes = w
    sv1, sh1, sv2, sh2 = _pool_matrices(batch)

    vmem = pl.BlockSpec(memory_space=pltpu.MemorySpace.VMEM)
    kernel = functools.partial(_lenet5_kernel, batch=batch)
    return pl.pallas_call(
        kernel,
        out_shape=jax.ShapeDtypeStruct((batch, 10), jnp.float32),
        in_specs=[vmem] * 15,
        out_specs=vmem,
        scratch_shapes=[
            pltpu.VMEM((batch * 14, 6 * 14), jnp.float32),   # S2 output
            pltpu.VMEM((batch * 5, 16 * 5), jnp.float32),    # S4 output
        ],
    )(x2, prep["t1"], prep["b1"], sv1, sh1,
      prep["t3"], prep["b3"], sv2, sh2,
      prep["w5"], prep["b5"], prep["w6"], prep["b6"], prep["wo"], prep["bo"])


# --------------------------------------------------------------------------
# LeNet5 parameters (deterministic, PyTorch-default-style uniform init)
# --------------------------------------------------------------------------
def init_params(key):
    def uni(key, shape, fan_in):
        bound = 1.0 / jnp.sqrt(fan_in)
        return jax.random.uniform(key, shape, jnp.float32, -bound, bound)

    keys = jax.random.split(key, 10)
    p = {}
    p["C1_w"] = uni(keys[0], (6, 1, 5, 5), 1 * 5 * 5)
    p["C1_b"] = uni(keys[1], (6,), 1 * 5 * 5)
    p["C3_w"] = uni(keys[2], (16, 6, 5, 5), 6 * 5 * 5)
    p["C3_b"] = uni(keys[3], (16,), 6 * 5 * 5)
    p["C5_w"] = uni(keys[4], (120, 400), 400)   # PyTorch Linear: (out, in)
    p["C5_b"] = uni(keys[5], (120,), 400)
    p["F6_w"] = uni(keys[6], (84, 120), 120)
    p["F6_b"] = uni(keys[7], (84,), 120)
    p["out_w"] = uni(keys[8], (10, 84), 84)
    p["out_b"] = uni(keys[9], (10,), 84)
    return p


# --------------------------------------------------------------------------
# Pure-JAX reference (uses the original PyTorch-layout parameters)
# --------------------------------------------------------------------------
def lenet5_reference(params, x):
    def conv(x, w, b):
        y = lax.conv_general_dilated(
            x, w, window_strides=(1, 1), padding="VALID",
            dimension_numbers=("NCHW", "OIHW", "NCHW"))
        return y + b[None, :, None, None]

    def pool(x):
        B, C, H, W = x.shape
        return x.reshape(B, C, H // 2, 2, W // 2, 2).mean(axis=(3, 5))

    B = x.shape[0]
    x = _scaled_tanh(conv(x, params["C1_w"], params["C1_b"]))
    x = pool(x)
    x = _scaled_tanh(conv(x, params["C3_w"], params["C3_b"]))
    x = pool(x)
    x = x.reshape(B, 16 * 5 * 5)
    x = _scaled_tanh(x @ params["C5_w"].T + params["C5_b"])
    x = _scaled_tanh(x @ params["F6_w"].T + params["F6_b"])
    x = x @ params["out_w"].T + params["out_b"]
    return x


if __name__ == "__main__":
    key = jax.random.PRNGKey(0)
    k_param, k_x = jax.random.split(key)
    params = init_params(k_param)
    prep = prepare_params(params)          # one-time weight re-layout

    # LeNet5 requires 32x32 inputs (so the flatten is 16*5*5 = 400).
    x = jax.random.normal(k_x, (2, 1, 32, 32), dtype=jnp.float32)

    fwd = jax.jit(lenet5_forward)
    out = jax.block_until_ready(fwd(prep, x))
    ref = jax.block_until_ready(lenet5_reference(params, x))

    assert out.shape == (2, 10), out.shape
    assert jnp.allclose(out, ref, rtol=1e-4, atol=1e-4), (
        "Pallas output mismatch vs JAX reference")
    print("KERNEL_OK")
</pallas_src>

<mosaic_0001>
module attributes {stable_mosaic.version = 11 : i64} {
  func.func @_lenet5_kernel(%arg0: memref<64x32xf32, #tpu.memory_space<vmem>>, %arg1: memref<160x168xf32, #tpu.memory_space<vmem>>, %arg2: memref<1x168xf32, #tpu.memory_space<vmem>>, %arg3: memref<28x60xf32, #tpu.memory_space<vmem>>, %arg4: memref<168x84xf32, #tpu.memory_space<vmem>>, %arg5: memref<420x160xf32, #tpu.memory_space<vmem>>, %arg6: memref<1x160xf32, #tpu.memory_space<vmem>>, %arg7: memref<10x24xf32, #tpu.memory_space<vmem>>, %arg8: memref<160x80xf32, #tpu.memory_space<vmem>>, %arg9: memref<400x120xf32, #tpu.memory_space<vmem>>, %arg10: memref<1x120xf32, #tpu.memory_space<vmem>>, %arg11: memref<120x84xf32, #tpu.memory_space<vmem>>, %arg12: memref<1x84xf32, #tpu.memory_space<vmem>>, %arg13: memref<84x10xf32, #tpu.memory_space<vmem>>, %arg14: memref<1x10xf32, #tpu.memory_space<vmem>>, %arg15: memref<2x10xf32, #tpu.memory_space<vmem>>, %arg16: memref<28x84xf32, #tpu.memory_space<vmem>>, %arg17: memref<10x80xf32, #tpu.memory_space<vmem>>) attributes {dimension_semantics = [], scalar_prefetch = 0 : i64, scratch_operands = 2 : i64, tpu.core_type = #tpu.core_type<tc>} {
    %c0 = arith.constant 0 : index
    %c0_0 = arith.constant 0 : index
    %0 = vector.load %arg0[%c0, %c0_0] : memref<64x32xf32, #tpu.memory_space<vmem>>, vector<60x32xf32>
    %c0_1 = arith.constant 0 : index
    %c0_2 = arith.constant 0 : index
    %1 = vector.load %arg1[%c0_1, %c0_2] : memref<160x168xf32, #tpu.memory_space<vmem>>, vector<32x168xf32>
    %cst = arith.constant dense<0.000000e+00> : vector<60x168xf32>
    %2 = tpu.matmul %0, %1, %cst {dimension_numbers = #tpu.dot_dimension_numbers<[1], [0], [0], [1], [0, 0, 1, 1], [], []>} : vector<60x32xf32>, vector<32x168xf32>, vector<60x168xf32> -> vector<60x168xf32>
    %c1 = arith.constant 1 : index
    %c0_3 = arith.constant 0 : index
    %3 = vector.load %arg0[%c1, %c0_3] : memref<64x32xf32, #tpu.memory_space<vmem>>, vector<60x32xf32>
    %c32 = arith.constant 32 : index
    %c0_4 = arith.constant 0 : index
    %4 = vector.load %arg1[%c32, %c0_4] : memref<160x168xf32, #tpu.memory_space<vmem>>, vector<32x168xf32>
    %cst_5 = arith.constant dense<0.000000e+00> : vector<60x168xf32>
    %5 = tpu.matmul %3, %4, %cst_5 {dimension_numbers = #tpu.dot_dimension_numbers<[1], [0], [0], [1], [0, 0, 1, 1], [], []>} : vector<60x32xf32>, vector<32x168xf32>, vector<60x168xf32> -> vector<60x168xf32>
    %6 = arith.addf %2, %5 : vector<60x168xf32>
    %c2 = arith.constant 2 : index
    %c0_6 = arith.constant 0 : index
    %7 = vector.load %arg0[%c2, %c0_6] : memref<64x32xf32, #tpu.memory_space<vmem>>, vector<60x32xf32>
    %c64 = arith.constant 64 : index
    %c0_7 = arith.constant 0 : index
    %8 = vector.load %arg1[%c64, %c0_7] : memref<160x168xf32, #tpu.memory_space<vmem>>, vector<32x168xf32>
    %cst_8 = arith.constant dense<0.000000e+00> : vector<60x168xf32>
    %9 = tpu.matmul %7, %8, %cst_8 {dimension_numbers = #tpu.dot_dimension_numbers<[1], [0], [0], [1], [0, 0, 1, 1], [], []>} : vector<60x32xf32>, vector<32x168xf32>, vector<60x168xf32> -> vector<60x168xf32>
    %10 = arith.addf %6, %9 : vector<60x168xf32>
    %c3 = arith.constant 3 : index
    %c0_9 = arith.constant 0 : index
    %11 = vector.load %arg0[%c3, %c0_9] : memref<64x32xf32, #tpu.memory_space<vmem>>, vector<60x32xf32>
    %c96 = arith.constant 96 : index
    %c0_10 = arith.constant 0 : index
    %12 = vector.load %arg1[%c96, %c0_10] : memref<160x168xf32, #tpu.memory_space<vmem>>, vector<32x168xf32>
    %cst_11 = arith.constant dense<0.000000e+00> : vector<60x168xf32>
    %13 = tpu.matmul %11, %12, %cst_11 {dimension_numbers = #tpu.dot_dimension_numbers<[1], [0], [0], [1], [0, 0, 1, 1], [], []>} : vector<60x32xf32>, vector<32x168xf32>, vector<60x168xf32> -> vector<60x168xf32>
    %14 = arith.addf %10, %13 : vector<60x168xf32>
    %c4 = arith.constant 4 : index
    %c0_12 = arith.constant 0 : index
    %15 = vector.load %arg0[%c4, %c0_12] : memref<64x32xf32, #tpu.memory_space<vmem>>, vector<60x32xf32>
    %c128 = arith.constant 128 : index
    %c0_13 = arith.constant 0 : index
    %16 = vector.load %arg1[%c128, %c0_13] : memref<160x168xf32, #tpu.memory_space<vmem>>, vector<32x168xf32>
    %cst_14 = arith.constant dense<0.000000e+00> : vector<60x168xf32>
    %17 = tpu.matmul %15, %16, %cst_14 {dimension_numbers = #tpu.dot_dimension_numbers<[1], [0], [0], [1], [0, 0, 1, 1], [], []>} : vector<60x32xf32>, vector<32x168xf32>, vector<60x168xf32> -> vector<60x168xf32>
    %18 = arith.addf %14, %17 : vector<60x168xf32>
    %c0_15 = arith.constant 0 : index
    %c0_16 = arith.constant 0 : index
    %19 = vector.load %arg2[%c0_15, %c0_16] : memref<1x168xf32, #tpu.memory_space<vmem>>, vector<1x168xf32>
    %20 = vector.broadcast %19 : vector<1x168xf32> to vector<60x168xf32>
    %21 = arith.addf %18, %20 : vector<60x168xf32>
    %cst_17 = arith.constant 0.666666686 : f32
    %22 = vector.broadcast %cst_17 : f32 to vector<60x168xf32>
    %23 = arith.mulf %22, %21 : vector<60x168xf32>
    %24 = math.tanh %23 : vector<60x168xf32>
    %cst_18 = arith.constant 1.715900e+00 : f32
    %25 = vector.broadcast %cst_18 : f32 to vector<60x168xf32>
    %26 = arith.mulf %25, %24 : vector<60x168xf32>
    %c0_19 = arith.constant 0 : index
    %c0_20 = arith.constant 0 : index
    %27 = vector.load %arg3[%c0_19, %c0_20] : memref<28x60xf32, #tpu.memory_space<vmem>>, vector<28x60xf32>
    %cst_21 = arith.constant dense<0.000000e+00> : vector<28x168xf32>
    %28 = tpu.matmul %27, %26, %cst_21 {dimension_numbers = #tpu.dot_dimension_numbers<[1], [0], [0], [1], [0, 0, 1, 1], [], []>} : vector<28x60xf32>, vector<60x168xf32>, vector<28x168xf32> -> vector<28x168xf32>
    %c0_22 = arith.constant 0 : index
    %c0_23 = arith.constant 0 : index
    %29 = vector.load %arg4[%c0_22, %c0_23] : memref<168x84xf32, #tpu.memory_space<vmem>>, vector<168x84xf32>
    %cst_24 = arith.constant dense<0.000000e+00> : vector<28x84xf32>
    %30 = tpu.matmul %28, %29, %cst_24 {dimension_numbers = #tpu.dot_dimension_numbers<[1], [0], [0], [1], [0, 0, 1, 1], [], []>} : vector<28x168xf32>, vector<168x84xf32>, vector<28x84xf32> -> vector<28x84xf32>
    %c0_25 = arith.constant 0 : index
    %c0_26 = arith.constant 0 : index
    %31 = vector.load %arg16[%c0_25, %c0_26] : memref<28x84xf32, #tpu.memory_space<vmem>>, vector<28x84xf32>
    tpu.vector_store %arg16[%c0_25, %c0_26], %30 {strides = array<i32>} : memref<28x84xf32, #tpu.memory_space<vmem>>, vector<28x84xf32>,
    %c0_27 = arith.constant 0 : index
    %c0_28 = arith.constant 0 : index
    %32 = vector.load %arg16[%c0_27, %c0_28] : memref<28x84xf32, #tpu.memory_space<vmem>>, vector<24x84xf32>
    %c0_29 = arith.constant 0 : index
    %c0_30 = arith.constant 0 : index
    %33 = vector.load %arg5[%c0_29, %c0_30] : memref<420x160xf32, #tpu.memory_space<vmem>>, vector<84x160xf32>
    %cst_31 = arith.constant dense<0.000000e+00> : vector<24x160xf32>
    %34 = tpu.matmul %32, %33, %cst_31 {dimension_numbers = #tpu.dot_dimension_numbers<[1], [0], [0], [1], [0, 0, 1, 1], [], []>} : vector<24x84xf32>, vector<84x160xf32>, vector<24x160xf32> -> vector<24x160xf32>
    %c1_32 = arith.constant 1 : index
    %c0_33 = arith.constant 0 : index
    %35 = vector.load %arg16[%c1_32, %c0_33] : memref<28x84xf32, #tpu.memory_space<vmem>>, vector<24x84xf32>
    %c84 = arith.constant 84 : index
    %c0_34 = arith.constant 0 : index
    %36 = vector.load %arg5[%c84, %c0_34] : memref<420x160xf32, #tpu.memory_space<vmem>>, vector<84x160xf32>
    %cst_35 = arith.constant dense<0.000000e+00> : vector<24x160xf32>
    %37 = tpu.matmul %35, %36, %cst_35 {dimension_numbers = #tpu.dot_dimension_numbers<[1], [0], [0], [1], [0, 0, 1, 1], [], []>} : vector<24x84xf32>, vector<84x160xf32>, vector<24x160xf32> -> vector<24x160xf32>
    %38 = arith.addf %34, %37 : vector<24x160xf32>
    %c2_36 = arith.constant 2 : index
    %c0_37 = arith.constant 0 : index
    %39 = vector.load %arg16[%c2_36, %c0_37] : memref<28x84xf32, #tpu.memory_space<vmem>>, vector<24x84xf32>
    %c168 = arith.constant 168 : index
    %c0_38 = arith.constant 0 : index
    %40 = vector.load %arg5[%c168, %c0_38] : memref<420x160xf32, #tpu.memory_space<vmem>>, vector<84x160xf32>
    %cst_39 = arith.constant dense<0.000000e+00> : vector<24x160xf32>
    %41 = tpu.matmul %39, %40, %cst_39 {dimension_numbers = #tpu.dot_dimension_numbers<[1], [0], [0], [1], [0, 0, 1, 1], [], []>} : vector<24x84xf32>, vector<84x160xf32>, vector<24x160xf32> -> vector<24x160xf32>
    %42 = arith.addf %38, %41 : vector<24x160xf32>
    %c3_40 = arith.constant 3 : index
    %c0_41 = arith.constant 0 : index
    %43 = vector.load %arg16[%c3_40, %c0_41] : memref<28x84xf32, #tpu.memory_space<vmem>>, vector<24x84xf32>
    %c252 = arith.constant 252 : index
    %c0_42 = arith.constant 0 : index
    %44 = vector.load %arg5[%c252, %c0_42] : memref<420x160xf32, #tpu.memory_space<vmem>>, vector<84x160xf32>
    %cst_43 = arith.constant dense<0.000000e+00> : vector<24x160xf32>
    %45 = tpu.matmul %43, %44, %cst_43 {dimension_numbers = #tpu.dot_dimension_numbers<[1], [0], [0], [1], [0, 0, 1, 1], [], []>} : vector<24x84xf32>, vector<84x160xf32>, vector<24x160xf32> -> vector<24x160xf32>
    %46 = arith.addf %42, %45 : vector<24x160xf32>
    %c4_44 = arith.constant 4 : index
    %c0_45 = arith.constant 0 : index
    %47 = vector.load %arg16[%c4_44, %c0_45] : memref<28x84xf32, #tpu.memory_space<vmem>>, vector<24x84xf32>
    %c336 = arith.constant 336 : index
    %c0_46 = arith.constant 0 : index
    %48 = vector.load %arg5[%c336, %c0_46] : memref<420x160xf32, #tpu.memory_space<vmem>>, vector<84x160xf32>
    %cst_47 = arith.constant dense<0.000000e+00> : vector<24x160xf32>
    %49 = tpu.matmul %47, %48, %cst_47 {dimension_numbers = #tpu.dot_dimension_numbers<[1], [0], [0], [1], [0, 0, 1, 1], [], []>} : vector<24x84xf32>, vector<84x160xf32>, vector<24x160xf32> -> vector<24x160xf32>
    %50 = arith.addf %46, %49 : vector<24x160xf32>
    %c0_48 = arith.constant 0 : index
    %c0_49 = arith.constant 0 : index
    %51 = vector.load %arg6[%c0_48, %c0_49] : memref<1x160xf32, #tpu.memory_space<vmem>>, vector<1x160xf32>
    %52 = vector.broadcast %51 : vector<1x160xf32> to vector<24x160xf32>
    %53 = arith.addf %50, %52 : vector<24x160xf32>
    %cst_50 = arith.constant 0.666666686 : f32
    %54 = vector.broadcast %cst_50 : f32 to vector<24x160xf32>
    %55 = arith.mulf %54, %53 : vector<24x160xf32>
    %56 = math.tanh %55 : vector<24x160xf32>
    %cst_51 = arith.constant 1.715900e+00 : f32
    %57 = vector.broadcast %cst_51 : f32 to vector<24x160xf32>
    %58 = arith.mulf %57, %56 : vector<24x160xf32>
    %c0_52 = arith.constant 0 : index
    %c0_53 = arith.constant 0 : index
    %59 = vector.load %arg7[%c0_52, %c0_53] : memref<10x24xf32, #tpu.memory_space<vmem>>, vector<10x24xf32>
    %cst_54 = arith.constant dense<0.000000e+00> : vector<10x160xf32>
    %60 = tpu.matmul %59, %58, %cst_54 {dimension_numbers = #tpu.dot_dimension_numbers<[1], [0], [0], [1], [0, 0, 1, 1], [], []>} : vector<10x24xf32>, vector<24x160xf32>, vector<10x160xf32> -> vector<10x160xf32>
    %c0_55 = arith.constant 0 : index
    %c0_56 = arith.constant 0 : index
    %61 = vector.load %arg8[%c0_55, %c0_56] : memref<160x80xf32, #tpu.memory_space<vmem>>, vector<160x80xf32>
    %cst_57 = arith.constant dense<0.000000e+00> : vector<10x80xf32>
    %62 = tpu.matmul %60, %61, %cst_57 {dimension_numbers = #tpu.dot_dimension_numbers<[1], [0], [0], [1], [0, 0, 1, 1], [], []>} : vector<10x160xf32>, vector<160x80xf32>, vector<10x80xf32> -> vector<10x80xf32>
    %c0_58 = arith.constant 0 : index
    %c0_59 = arith.constant 0 : index
    %63 = vector.load %arg17[%c0_58, %c0_59] : memref<10x80xf32, #tpu.memory_space<vmem>>, vector<10x80xf32>
    tpu.vector_store %arg17[%c0_58, %c0_59], %62 {strides = array<i32>} : memref<10x80xf32, #tpu.memory_space<vmem>>, vector<10x80xf32>,
    %c0_60 = arith.constant 0 : index
    %c0_61 = arith.constant 0 : index
    %64 = vector.load %arg10[%c0_60, %c0_61] : memref<1x120xf32, #tpu.memory_space<vmem>>, vector<1x120xf32>
    %c0_62 = arith.constant 0 : index
    %c0_63 = arith.constant 0 : index
    %65 = vector.load %arg17[%c0_62, %c0_63] : memref<10x80xf32, #tpu.memory_space<vmem>>, vector<1x80xf32>
    %c0_64 = arith.constant 0 : index
    %c0_65 = arith.constant 0 : index
    %66 = vector.load %arg9[%c0_64, %c0_65] : memref<400x120xf32, #tpu.memory_space<vmem>>, vector<80x120xf32>
    %cst_66 = arith.constant dense<0.000000e+00> : vector<1x120xf32>
    %67 = tpu.matmul %65, %66, %cst_66 {dimension_numbers = #tpu.dot_dimension_numbers<[1], [0], [0], [1], [0, 0, 1, 1], [], []>} : vector<1x80xf32>, vector<80x120xf32>, vector<1x120xf32> -> vector<1x120xf32>
    %68 = arith.addf %64, %67 : vector<1x120xf32>
    %c1_67 = arith.constant 1 : index
    %c0_68 = arith.constant 0 : index
    %69 = vector.load %arg17[%c1_67, %c0_68] : memref<10x80xf32, #tpu.memory_space<vmem>>, vector<1x80xf32>
    %c80 = arith.constant 80 : index
    %c0_69 = arith.constant 0 : index
    %70 = vector.load %arg9[%c80, %c0_69] : memref<400x120xf32, #tpu.memory_space<vmem>>, vector<80x120xf32>
    %cst_70 = arith.constant dense<0.000000e+00> : vector<1x120xf32>
    %71 = tpu.matmul %69, %70, %cst_70 {dimension_numbers = #tpu.dot_dimension_numbers<[1], [0], [0], [1], [0, 0, 1, 1], [], []>} : vector<1x80xf32>, vector<80x120xf32>, vector<1x120xf32> -> vector<1x120xf32>
    %72 = arith.addf %68, %71 : vector<1x120xf32>
    %c2_71 = arith.constant 2 : index
    %c0_72 = arith.constant 0 : index
    %73 = vector.load %arg17[%c2_71, %c0_72] : memref<10x80xf32, #tpu.memory_space<vmem>>, vector<1x80xf32>
    %c160 = arith.constant 160 : index
    %c0_73 = arith.constant 0 : index
    %74 = vector.load %arg9[%c160, %c0_73] : memref<400x120xf32, #tpu.memory_space<vmem>>, vector<80x120xf32>
    %cst_74 = arith.constant dense<0.000000e+00> : vector<1x120xf32>
    %75 = tpu.matmul %73, %74, %cst_74 {dimension_numbers = #tpu.dot_dimension_numbers<[1], [0], [0], [1], [0, 0, 1, 1], [], []>} : vector<1x80xf32>, vector<80x120xf32>, vector<1x120xf32> -> vector<1x120xf32>
    %76 = arith.addf %72, %75 : vector<1x120xf32>
    %c3_75 = arith.constant 3 : index
    %c0_76 = arith.constant 0 : index
    %77 = vector.load %arg17[%c3_75, %c0_76] : memref<10x80xf32, #tpu.memory_space<vmem>>, vector<1x80xf32>
    %c240 = arith.constant 240 : index
    %c0_77 = arith.constant 0 : index
    %78 = vector.load %arg9[%c240, %c0_77] : memref<400x120xf32, #tpu.memory_space<vmem>>, vector<80x120xf32>
    %cst_78 = arith.constant dense<0.000000e+00> : vector<1x120xf32>
    %79 = tpu.matmul %77, %78, %cst_78 {dimension_numbers = #tpu.dot_dimension_numbers<[1], [0], [0], [1], [0, 0, 1, 1], [], []>} : vector<1x80xf32>, vector<80x120xf32>, vector<1x120xf32> -> vector<1x120xf32>
    %80 = arith.addf %76, %79 : vector<1x120xf32>
    %c4_79 = arith.constant 4 : index
    %c0_80 = arith.constant 0 : index
    %81 = vector.load %arg17[%c4_79, %c0_80] : memref<10x80xf32, #tpu.memory_space<vmem>>, vector<1x80xf32>
    %c320 = arith.constant 320 : index
    %c0_81 = arith.constant 0 : index
    %82 = vector.load %arg9[%c320, %c0_81] : memref<400x120xf32, #tpu.memory_space<vmem>>, vector<80x120xf32>
    %cst_82 = arith.constant dense<0.000000e+00> : vector<1x120xf32>
    %83 = tpu.matmul %81, %82, %cst_82 {dimension_numbers = #tpu.dot_dimension_numbers<[1], [0], [0], [1], [0, 0, 1, 1], [], []>} : vector<1x80xf32>, vector<80x120xf32>, vector<1x120xf32> -> vector<1x120xf32>
    %84 = arith.addf %80, %83 : vector<1x120xf32>
    %cst_83 = arith.constant 0.666666686 : f32
    %85 = vector.broadcast %cst_83 : f32 to vector<1x120xf32>
    %86 = arith.mulf %85, %84 : vector<1x120xf32>
    %87 = math.tanh %86 : vector<1x120xf32>
    %cst_84 = arith.constant 1.715900e+00 : f32
    %88 = vector.broadcast %cst_84 : f32 to vector<1x120xf32>
    %89 = arith.mulf %88, %87 : vector<1x120xf32>
    %c0_85 = arith.constant 0 : index
    %c0_86 = arith.constant 0 : index
    %90 = vector.load %arg11[%c0_85, %c0_86] : memref<120x84xf32, #tpu.memory_space<vmem>>, vector<120x84xf32>
    %cst_87 = arith.constant dense<0.000000e+00> : vector<1x84xf32>
    %91 = tpu.matmul %89, %90, %cst_87 {dimension_numbers = #tpu.dot_dimension_numbers<[1], [0], [0], [1], [0, 0, 1, 1], [], []>} : vector<1x120xf32>, vector<120x84xf32>, vector<1x84xf32> -> vector<1x84xf32>
    %c0_88 = arith.constant 0 : index
    %c0_89 = arith.constant 0 : index
    %92 = vector.load %arg12[%c0_88, %c0_89] : memref<1x84xf32, #tpu.memory_space<vmem>>, vector<1x84xf32>
    %93 = arith.addf %91, %92 : vector<1x84xf32>
    %cst_90 = arith.constant 0.666666686 : f32
    %94 = vector.broadcast %cst_90 : f32 to vector<1x84xf32>
    %95 = arith.mulf %94, %93 : vector<1x84xf32>
    %96 = math.tanh %95 : vector<1x84xf32>
    %cst_91 = arith.constant 1.715900e+00 : f32
    %97 = vector.broadcast %cst_91 : f32 to vector<1x84xf32>
    %98 = arith.mulf %97, %96 : vector<1x84xf32>
    %c0_92 = arith.constant 0 : index
    %c0_93 = arith.constant 0 : index
    %99 = vector.load %arg13[%c0_92, %c0_93] : memref<84x10xf32, #tpu.memory_space<vmem>>, vector<84x10xf32>
    %cst_94 = arith.constant dense<0.000000e+00> : vector<1x10xf32>
    %100 = tpu.matmul %98, %99, %cst_94 {dimension_numbers = #tpu.dot_dimension_numbers<[1], [0], [0], [1], [0, 0, 1, 1], [], []>} : vector<1x84xf32>, vector<84x10xf32>, vector<1x10xf32> -> vector<1x10xf32>
    %c0_95 = arith.constant 0 : index
    %c0_96 = arith.constant 0 : index
    %101 = vector.load %arg14[%c0_95, %c0_96] : memref<1x10xf32, #tpu.memory_space<vmem>>, vector<1x10xf32>
    %102 = arith.addf %100, %101 : vector<1x10xf32>
    %c0_97 = arith.constant 0 : index
    %c0_98 = arith.constant 0 : index
    %103 = vector.load %arg15[%c0_97, %c0_98] : memref<2x10xf32, #tpu.memory_space<vmem>>, vector<1x10xf32>
    tpu.vector_store %arg15[%c0_97, %c0_98], %102 {strides = array<i32>} : memref<2x10xf32, #tpu.memory_space<vmem>>, vector<1x10xf32>,
    %c0_99 = arith.constant 0 : index
    %c0_100 = arith.constant 0 : index
    %104 = vector.load %arg10[%c0_99, %c0_100] : memref<1x120xf32, #tpu.memory_space<vmem>>, vector<1x120xf32>
    %c5 = arith.constant 5 : index
    %c0_101 = arith.constant 0 : index
    %105 = vector.load %arg17[%c5, %c0_101] : memref<10x80xf32, #tpu.memory_space<vmem>>, vector<1x80xf32>
    %c0_102 = arith.constant 0 : index
    %c0_103 = arith.constant 0 : index
    %106 = vector.load %arg9[%c0_102, %c0_103] : memref<400x120xf32, #tpu.memory_space<vmem>>, vector<80x120xf32>
    %cst_104 = arith.constant dense<0.000000e+00> : vector<1x120xf32>
    %107 = tpu.matmul %105, %106, %cst_104 {dimension_numbers = #tpu.dot_dimension_numbers<[1], [0], [0], [1], [0, 0, 1, 1], [], []>} : vector<1x80xf32>, vector<80x120xf32>, vector<1x120xf32> -> vector<1x120xf32>
    %108 = arith.addf %104, %107 : vector<1x120xf32>
    %c6 = arith.constant 6 : index
    %c0_105 = arith.constant 0 : index
    %109 = vector.load %arg17[%c6, %c0_105] : memref<10x80xf32, #tpu.memory_space<vmem>>, vector<1x80xf32>
    %c80_106 = arith.constant 80 : index
    %c0_107 = arith.constant 0 : index
    %110 = vector.load %arg9[%c80_106, %c0_107] : memref<400x120xf32, #tpu.memory_space<vmem>>, vector<80x120xf32>
    %cst_108 = arith.constant dense<0.000000e+00> : vector<1x120xf32>
    %111 = tpu.matmul %109, %110, %cst_108 {dimension_numbers = #tpu.dot_dimension_numbers<[1], [0], [0], [1], [0, 0, 1, 1], [], []>} : vector<1x80xf32>, vector<80x120xf32>, vector<1x120xf32> -> vector<1x120xf32>
    %112 = arith.addf %108, %111 : vector<1x120xf32>
    %c7 = arith.constant 7 : index
    %c0_109 = arith.constant 0 : index
    %113 = vector.load %arg17[%c7, %c0_109] : memref<10x80xf32, #tpu.memory_space<vmem>>, vector<1x80xf32>
    %c160_110 = arith.constant 160 : index
    %c0_111 = arith.constant 0 : index
    %114 = vector.load %arg9[%c160_110, %c0_111] : memref<400x120xf32, #tpu.memory_space<vmem>>, vector<80x120xf32>
    %cst_112 = arith.constant dense<0.000000e+00> : vector<1x120xf32>
    %115 = tpu.matmul %113, %114, %cst_112 {dimension_numbers = #tpu.dot_dimension_numbers<[1], [0], [0], [1], [0, 0, 1, 1], [], []>} : vector<1x80xf32>, vector<80x120xf32>, vector<1x120xf32> -> vector<1x120xf32>
    %116 = arith.addf %112, %115 : vector<1x120xf32>
    %c8 = arith.constant 8 : index
    %c0_113 = arith.constant 0 : index
    %117 = vector.load %arg17[%c8, %c0_113] : memref<10x80xf32, #tpu.memory_space<vmem>>, vector<1x80xf32>
    %c240_114 = arith.constant 240 : index
    %c0_115 = arith.constant 0 : index
    %118 = vector.load %arg9[%c240_114, %c0_115] : memref<400x120xf32, #tpu.memory_space<vmem>>, vector<80x120xf32>
    %cst_116 = arith.constant dense<0.000000e+00> : vector<1x120xf32>
    %119 = tpu.matmul %117, %118, %cst_116 {dimension_numbers = #tpu.dot_dimension_numbers<[1], [0], [0], [1], [0, 0, 1, 1], [], []>} : vector<1x80xf32>, vector<80x120xf32>, vector<1x120xf32> -> vector<1x120xf32>
    %120 = arith.addf %116, %119 : vector<1x120xf32>
    %c9 = arith.constant 9 : index
    %c0_117 = arith.constant 0 : index
    %121 = vector.load %arg17[%c9, %c0_117] : memref<10x80xf32, #tpu.memory_space<vmem>>, vector<1x80xf32>
    %c320_118 = arith.constant 320 : index
    %c0_119 = arith.constant 0 : index
    %122 = vector.load %arg9[%c320_118, %c0_119] : memref<400x120xf32, #tpu.memory_space<vmem>>, vector<80x120xf32>
    %cst_120 = arith.constant dense<0.000000e+00> : vector<1x120xf32>
    %123 = tpu.matmul %121, %122, %cst_120 {dimension_numbers = #tpu.dot_dimension_numbers<[1], [0], [0], [1], [0, 0, 1, 1], [], []>} : vector<1x80xf32>, vector<80x120xf32>, vector<1x120xf32> -> vector<1x120xf32>
    %124 = arith.addf %120, %123 : vector<1x120xf32>
    %cst_121 = arith.constant 0.666666686 : f32
    %125 = vector.broadcast %cst_121 : f32 to vector<1x120xf32>
    %126 = arith.mulf %125, %124 : vector<1x120xf32>
    %127 = math.tanh %126 : vector<1x120xf32>
    %cst_122 = arith.constant 1.715900e+00 : f32
    %128 = vector.broadcast %cst_122 : f32 to vector<1x120xf32>
    %129 = arith.mulf %128, %127 : vector<1x120xf32>
    %c0_123 = arith.constant 0 : index
    %c0_124 = arith.constant 0 : index
    %130 = vector.load %arg11[%c0_123, %c0_124] : memref<120x84xf32, #tpu.memory_space<vmem>>, vector<120x84xf32>
    %cst_125 = arith.constant dense<0.000000e+00> : vector<1x84xf32>
    %131 = tpu.matmul %129, %130, %cst_125 {dimension_numbers = #tpu.dot_dimension_numbers<[1], [0], [0], [1], [0, 0, 1, 1], [], []>} : vector<1x120xf32>, vector<120x84xf32>, vector<1x84xf32> -> vector<1x84xf32>
    %c0_126 = arith.constant 0 : index
    %c0_127 = arith.constant 0 : index
    %132 = vector.load %arg12[%c0_126, %c0_127] : memref<1x84xf32, #tpu.memory_space<vmem>>, vector<1x84xf32>
    %133 = arith.addf %131, %132 : vector<1x84xf32>
    %cst_128 = arith.constant 0.666666686 : f32
    %134 = vector.broadcast %cst_128 : f32 to vector<1x84xf32>
    %135 = arith.mulf %134, %133 : vector<1x84xf32>
    %136 = math.tanh %135 : vector<1x84xf32>
    %cst_129 = arith.constant 1.715900e+00 : f32
    %137 = vector.broadcast %cst_129 : f32 to vector<1x84xf32>
    %138 = arith.mulf %137, %136 : vector<1x84xf32>
    %c0_130 = arith.constant 0 : index
    %c0_131 = arith.constant 0 : index
    %139 = vector.load %arg13[%c0_130, %c0_131] : memref<84x10xf32, #tpu.memory_space<vmem>>, vector<84x10xf32>
    %cst_132 = arith.constant dense<0.000000e+00> : vector<1x10xf32>
    %140 = tpu.matmul %138, %139, %cst_132 {dimension_numbers = #tpu.dot_dimension_numbers<[1], [0], [0], [1], [0, 0, 1, 1], [], []>} : vector<1x84xf32>, vector<84x10xf32>, vector<1x10xf32> -> vector<1x10xf32>
    %c0_133 = arith.constant 0 : index
    %c0_134 = arith.constant 0 : index
    %141 = vector.load %arg14[%c0_133, %c0_134] : memref<1x10xf32, #tpu.memory_space<vmem>>, vector<1x10xf32>
    %142 = arith.addf %140, %141 : vector<1x10xf32>
    %c1_135 = arith.constant 1 : index
    %c0_136 = arith.constant 0 : index
    %143 = vector.load %arg15[%c1_135, %c0_136] : memref<2x10xf32, #tpu.memory_space<vmem>>, vector<1x10xf32>
    tpu.vector_store %arg15[%c1_135, %c0_136], %142 {strides = array<i32>} : memref<2x10xf32, #tpu.memory_space<vmem>>, vector<1x10xf32>,
    return
  }
}

</mosaic_0001>

<bundles_post_ra>
// kernel: lenet5_forward.1
= control target key start
LH: loop header
LB: loop body
LE: loop exit
PB: predicated region body
PF: predicated region fallthrough
CT: control target
= control target key end

     0   :  { %v4677_v7 = vmov 0.0   ;;  %vm83_vm0 = vcmask 261120   ;;  %s6232_s0 = inlined_call_operand.vmem [shape: f32[64,32], index: 0, kind: input, shape index: {}]   ;;  %s6233_s1 = inlined_call_operand.vmem [shape: f32[160,168], index: 1, kind: input, shape index: {}]   ;;  %s6234_s2 = inlined_call_operand.vmem [shape: f32[1,168], index: 2, kind: input, shape index: {}]   ;;  %s6235_s3 = inlined_call_operand.vmem [shape: f32[28,60], index: 3, kind: input, shape index: {}]   ;;  %s6236_s4 = inlined_call_operand.vmem [shape: f32[168,84], index: 4, kind: input, shape index: {}]   ;;  %s6237_s5 = inlined_call_operand.vmem [shape: f32[420,160], index: 5, kind: input, shape index: {}]   ;;  %s6238_s6 = inlined_call_operand.vmem [shape: f32[1,160], index: 6, kind: input, shape index: {}]   ;;  %s6239_s7 = inlined_call_operand.vmem [shape: f32[10,24], index: 7, kind: input, shape index: {}]   ;;  %s6240_s8 = inlined_call_operand.vmem [shape: f32[160,80], index: 8, kind: input, shape index: {}]   ;;  %s6241_s9 = inlined_call_operand.vmem [shape: f32[400,120], index: 9, kind: input, shape index: {}]   ;;  %s6242_s10 = inlined_call_operand.vmem [shape: f32[1,120], index: 10, kind: input, shape index: {}]   ;;  %s6243_s11 = inlined_call_operand.vmem [shape: f32[120,84], index: 11, kind: input, shape index: {}]   ;;  %s6244_s12 = inlined_call_operand.vmem [shape: f32[1,84], index: 12, kind: input, shape index: {}]   ;;  %s6245_s13 = inlined_call_operand.vmem [shape: f32[84,10], index: 13, kind: input, shape index: {}]   ;;  %s6246_s14 = inlined_call_operand.vmem [shape: f32[1,10], index: 14, kind: input, shape index: {}]   ;;  %s6247_s15 = inlined_call_operand.hbm [shape: f32[2,10], index: 15, kind: output, shape index: {}]  }
   0x1   :  { %v76_v0 = vld [vmem:[%s6233_s1 + $0x48] sm:$0xff]  ;;  %v78_v1 = vld [vmem:[%s6233_s1 + $0x58] sm:$0xff]  ;;  %v75_v2 = vld [vmem:[%s6233_s1 + $0x40] sm:$0xff]  ;;  %172 = vmatprep.mubr.f32.mxu0 %v4677_v7  ;;  %1029 = vmatprep.mubr.f32.mxu1 %v4677_v7 }
   0x2   :  { %v4046_v3 = vpack.c.bf16 %v78_v1, %v76_v0  ;;  %v77_v4 = vld [vmem:[%s6233_s1 + $0x50] sm:$0xff]  ;;  %v80_v5 = vld [vmem:[%s6233_s1 + $0x68] sm:$0xff]  ;;  %v82_v6 = vld [vmem:[%s6233_s1 + $0x78] sm:$0xff] }
   0x3   :  { %v4048_v8 = vpack.c.bf16 %v77_v4, %v75_v2  ;;  %v4050_v9 = vpack.c.bf16 %v82_v6, %v80_v5  ;;  %v79_v10 = vld [vmem:[%s6233_s1 + $0x60] sm:$0xff]  ;;  %v81_v11 = vld [vmem:[%s6233_s1 + $0x70] sm:$0xff]  ;;  %v60_v12 = vld [vmem:[%s6233_s1 + $0x8] sm:$0xff] }
   0x4   :  { %4047 = vmatprep.subr.bf16.mxu0 %v4046_v3  ;;  %v62_v13 = vld [vmem:[%s6233_s1 + $0x18] sm:$0xff]  ;;  %v4052_v14 = vpack.c.bf16 %v81_v11, %v79_v10  ;;  %v59_v16 = vld [vmem:[%s6233_s1] sm:$0xff]  ;;  %v61_v17 = vld [vmem:[%s6233_s1 + $0x10] sm:$0xff] }
   0x5   :  { %4049 = vmatpush1.bf16.msra.mxu0 %v4048_v8  ;;  %v4054_v15 = vpack.c.bf16 %v62_v13, %v60_v12  ;;  %v64_v18 = vld [vmem:[%s6233_s1 + $0x28] sm:$0xff]  ;;  %v66_v19 = vld [vmem:[%s6233_s1 + $0x38] sm:$0xff]  ;;  %v4056_v21 = vpack.c.bf16 %v61_v17, %v59_v16  ;;  %v63_v23 = vld [vmem:[%s6233_s1 + $0x20] sm:$0xff] }
   0x6   :  { %4051 = vmatprep.subr.bf16.mxu0 %v4050_v9  ;;  %v67_v20 = vld [vmem:[%s6232_s0 + $0x1] sm:$0xff]  ;;  %v4058_v22 = vpack.c.bf16 %v66_v19, %v64_v18  ;;  %v65_v24 = vld [vmem:[%s6233_s1 + $0x30] sm:$0xff]  ;;  %v369_v26 = vld [vmem:[%s6233_s1 + $0x98] sm:$0xff] }
   0x7   :  { %v367_v25 = vld [vmem:[%s6233_s1 + $0x88] sm:$0xff]  ;;  %v4060_v28 = vpack.c.bf16 %v65_v24, %v63_v23  ;;  %v69_v30 = vld [vmem:[%s6232_s0 + $0x11] sm:$0xff]  ;;  %v70_v31 = vld [vmem:[%s6232_s0 + $0x19] sm:$0xff] }
   0x8   :  { %v68_v27 = vld [vmem:[%s6232_s0 + $0x9] sm:$0xff]  ;;  %v4062_v29 = vpack.c.bf16 %v369_v26, %v367_v25  ;;  %v71_v32 = vld [vmem:[%s6232_s0 + $0x21] sm:$0xff] }
   0x9   :  { %4053 = vmatpush1.bf16.msra.mxu0 %v4052_v14 }
   0xa   :  { %4055 = vmatprep.subr.bf16.mxu0 %v4054_v15 }
   0xc   :  { %3439 = vmatmul.mubr.msk.f32.vlgmr.msra.gmra.mrb[0].mxu0 %vm83_vm0, %v67_v20 }
   0xd   :  { %178 = vmatprep.mubr.f32.mxu0 %v4677_v7  ;;  %4057 = vmatpush1.bf16.msra.mxu0 %v4056_v21 }
   0xe   :  { %4059 = vmatprep.subr.bf16.mxu0 %v4058_v22 }
  0x10   :  { %3440 = vmatmul.mubr.msk.f32.gmra.mrb[2].mxu0 %vm83_vm0, %v68_v27 }
  0x11   :  { %184 = vmatprep.mubr.f32.mxu0 %v4677_v7  ;;  %4061 = vmatpush1.bf16.msra.mxu0 %v4060_v28 }
  0x12   :  { %4063 = vmatprep.subr.bf16.mxu0 %v4062_v29 }
  0x14   :  { %3441 = vmatmul.mubr.msk.f32.gmra.mrb[4].mxu0 %vm83_vm0, %v69_v30 }
  0x15   :  { %190 = vmatprep.mubr.f32.mxu0 %v4677_v7 }
  0x18   :  { %3442 = vmatmul.mubr.msk.f32.gmra.mrb[6].mxu0 %vm83_vm0, %v70_v31 }
  0x19   :  { %196 = vmatprep.mubr.f32.mxu0 %v4677_v7 }
  0x1a   :  { %20 = vsyncpa [#allocation5], 0  ;;  %v72_v33 = vld [vmem:[%s6232_s0 + $0x29] sm:$0xff]  ;;  %v73_v34 = vld [vmem:[%s6232_s0 + $0x31] sm:$0xff]  ;;  %vm958_vm1 = vcmask 1043456   ;;  %vm4679_vm2 = vmmov 1  }
  0x1b   :  { %v74_v35 = vld [vmem:[%s6232_s0 + $0x39] sm:$0xf]  ;;  %v366_v36 = vld [vmem:[%s6233_s1 + $0x80] sm:$0xff]  ;;  %v368_v37 = vld [vmem:[%s6233_s1 + $0x90] sm:$0xff]  ;;  %vm945_vm4 = vcmask 490496   ;;  %vm1075_vm5 = vcmask 326656  }
  0x1c   :  { %3443 = vmatmul.mubr.msk.f32.gmra.mrb[8].mxu0 %vm83_vm0, %v71_v32  ;;  %v371_v38 = vld [vmem:[%s6233_s1 + $0xa8] sm:$0xff]  ;;  %v373_v39 = vld [vmem:[%s6233_s1 + $0xb8] sm:$0xff]  ;;  %v51_v40 = vld [vmem:[%s6232_s0] sm:$0xff]  ;;  %v4064_v41 = vpack.c.bf16 %v368_v37, %v366_v36  ;;  %vm1173_vm6 = vcmask 687104   ;;  %vm1177_vm7 = vcmask 683008   ;;  %vm2014_vm8 = vcmask 195584  }
  0x1d   :  { %202 = vmatprep.mubr.f32.mxu0 %v4677_v7  ;;  %v4066_v42 = vpack.c.bf16 %v373_v39, %v371_v38  ;;  %v370_v43 = vld [vmem:[%s6233_s1 + $0xa0] sm:$0xff]  ;;  %v372_v44 = vld [vmem:[%s6233_s1 + $0xb0] sm:$0xff]  ;;  %v536_v45 = vld [vmem:[%s6233_s1 + $0xc8] sm:$0xff]  ;;  %v4678_v38 = vmov 0.0|0.0   ;;  %v867_v39 = vlaneseq  ;;  %vm4680_vm9 = vmmov 0  }
  0x1e   :  { %v538_v46 = vld [vmem:[%s6233_s1 + $0xd8] sm:$0xff]  ;;  %v52_v47 = vld [vmem:[%s6232_s0 + $0x8] sm:$0xff]  ;;  %v4068_v48 = vpack.c.bf16 %v372_v44, %v370_v43  ;;  %v53_v50 = vld [vmem:[%s6232_s0 + $0x10] sm:$0xff]  ;;  %vm2199_vm10 = vcmask 654336   ;;  %vm2201_vm11 = vcmask 648192   ;;  %vm2648_vm12 = vcmask 982016  }
  0x1f   :  { %v4070_v49 = vpack.c.bf16 %v538_v46, %v536_v45  ;;  %v54_v51 = vld [vmem:[%s6232_s0 + $0x18] sm:$0xff]  ;;  %v55_v52 = vld [vmem:[%s6232_s0 + $0x20] sm:$0xff]  ;;  %v56_v53 = vld [vmem:[%s6232_s0 + $0x28] sm:$0xff]  ;;  %vm2813_vm13 = vcmask 73728  }
  0x20   :  { %3444 = vmatmul.mubr.msk.f32.gmra.mrb[10].mxu0 %vm83_vm0, %v72_v33  ;;  %v57_v54 = vld [vmem:[%s6232_s0 + $0x30] sm:$0xff]  ;;  %v58_v55 = vld [vmem:[%s6232_s0 + $0x38] sm:$0xf]  ;;  %v535_v56 = vld [vmem:[%s6233_s1 + $0xc0] sm:$0xff] }
  0x21   :  { %208 = vmatprep.mubr.f32.mxu0 %v4677_v7  ;;  %v537_v57 = vld [vmem:[%s6233_s1 + $0xd0] sm:$0xff]  ;;  %v540_v58 = vld [vmem:[%s6233_s1 + $0xe8] sm:$0xff]  ;;  %v542_v59 = vld [vmem:[%s6233_s1 + $0xf8] sm:$0xff] }
  0x22   :  { %v358_v60 = vld [vmem:[%s6232_s0 + $0x2] sm:$0xff]  ;;  %v4072_v61 = vpack.c.bf16 %v537_v57, %v535_v56  ;;  %v4074_v62 = vpack.c.bf16 %v542_v59, %v540_v58  ;;  %v541_v0 = vld [vmem:[%s6233_s1 + $0xf0] sm:$0xff]  ;;  %v707_v2 = vld [vmem:[%s6233_s1 + $0x118] sm:$0xff] }
  0x23   :  { %v539_v63 = vld [vmem:[%s6233_s1 + $0xe0] sm:$0xff]  ;;  %v705_v1 = vld [vmem:[%s6233_s1 + $0x108] sm:$0xff]  ;;  %v360_v6 = vld [vmem:[%s6232_s0 + $0x12] sm:$0xff] }
  0x24   :  { %3445 = vmatmul.mubr.msk.f32.gmra.mrb[12].mxu0 %vm83_vm0, %v73_v34  ;;  %v359_v3 = vld [vmem:[%s6232_s0 + $0xa] sm:$0xff]  ;;  %v4076_v4 = vpack.c.bf16 %v541_v0, %v539_v63  ;;  %v4078_v5 = vpack.c.bf16 %v707_v2, %v705_v1  ;;  %v361_v8 = vld [vmem:[%s6232_s0 + $0x1a] sm:$0xff]  ;;  %v362_v9 = vld [vmem:[%s6232_s0 + $0x22] sm:$0xff] }
  0x25   :  { %214 = vmatprep.mubr.f32.mxu0 %v4677_v7  ;;  %v363_v10 = vld [vmem:[%s6232_s0 + $0x2a] sm:$0xff]  ;;  %v364_v11 = vld [vmem:[%s6232_s0 + $0x32] sm:$0xff]  ;;  %v365_v12 = vld [vmem:[%s6232_s0 + $0x3a] sm:$0xf] }
  0x26   :  { %v704_v13 = vld [vmem:[%s6233_s1 + $0x100] sm:$0xff]  ;;  %v706_v14 = vld [vmem:[%s6233_s1 + $0x110] sm:$0xff]  ;;  %v709_v15 = vld [vmem:[%s6233_s1 + $0x128] sm:$0xff] }
  0x27   :  { %v711_v16 = vld [vmem:[%s6233_s1 + $0x138] sm:$0xff]  ;;  %v527_v17 = vld [vmem:[%s6232_s0 + $0x3] sm:$0xff]  ;;  %v4080_v18 = vpack.c.bf16 %v706_v14, %v704_v13  ;;  %v710_v21 = vld [vmem:[%s6233_s1 + $0x130] sm:$0xff] }
  0x28   :  { %3446 = vmatmul.mubr.msk.f32.gmra.mrb[14].mxu0 %vm83_vm0, %v74_v35  ;;  %v4082_v19 = vpack.c.bf16 %v711_v16, %v709_v15  ;;  %v708_v20 = vld [vmem:[%s6233_s1 + $0x120] sm:$0xff]  ;;  %v528_v22 = vld [vmem:[%s6232_s0 + $0xb] sm:$0xff]  ;;  %v529_v24 = vld [vmem:[%s6232_s0 + $0x13] sm:$0xff] }
  0x29   :  { %309 = vmatprep.mubr.f32.mxu0 %v4677_v7  ;;  %v4084_v23 = vpack.c.bf16 %v710_v21, %v708_v20  ;;  %v530_v25 = vld [vmem:[%s6232_s0 + $0x1b] sm:$0xff]  ;;  %v531_v26 = vld [vmem:[%s6232_s0 + $0x23] sm:$0xff]  ;;  %v532_v27 = vld [vmem:[%s6232_s0 + $0x2b] sm:$0xff] }
  0x2a   :  { %v533_v28 = vld [vmem:[%s6232_s0 + $0x33] sm:$0xff]  ;;  %v534_v29 = vld [vmem:[%s6232_s0 + $0x3b] sm:$0xf]  ;;  %v696_v30 = vld [vmem:[%s6232_s0 + $0x4] sm:$0xff] }
  0x2b   :  { %v697_v31 = vld [vmem:[%s6232_s0 + $0xc] sm:$0xff]  ;;  %v698_v32 = vld [vmem:[%s6232_s0 + $0x14] sm:$0xff]  ;;  %v699_v33 = vld [vmem:[%s6232_s0 + $0x1c] sm:$0xff] }
  0x2c   :  { %3447 = vmatmul.mubr.msk.f32.vlgmr.msra.gmra.mrb[0].mxu0 %vm83_vm0, %v51_v40  ;;  %v700_v34 = vld [vmem:[%s6232_s0 + $0x24] sm:$0xff]  ;;  %v701_v35 = vld [vmem:[%s6232_s0 + $0x2c] sm:$0xff]  ;;  %v702_v36 = vld [vmem:[%s6232_s0 + $0x34] sm:$0xff]  ;;  %v5084_v40 = vshrl.u32 %v867_v39, 7 }
  0x2d   :  { %315 = vmatprep.mubr.f32.mxu0 %v4677_v7  ;;  %4065 = vmatpush1.bf16.msra.mxu0 %v4064_v41  ;;  %v703_v37 = vld [vmem:[%s6232_s0 + $0x3c] sm:$0xf]  ;;  %vm4099_vm3 = vmpackc.low %vm958_vm1, %vm4679_vm2 }
  0x2e   :  { %4067 = vmatprep.subr.bf16.mxu0 %v4066_v42  ;;  %v869_v41 = vsub.s32 0, %v5084_v40  ;;  %v865_v42 = vld [vmem:[%s6234_s2] sm:$0x3]  ;;  %v873_v43 = vsub.s32 1, %v5084_v40 }
  0x30   :  { %3448 = vmatmul.mubr.msk.f32.gmra.mrb[2].mxu0 %vm83_vm0, %v52_v47  ;;  %v5093_v44 = vrot.slane %v865_v42, %v869_v41  ;;  %v5097_v45 = vrot.slane %v865_v42, %v873_v43 }
  0x31   :  { %321 = vmatprep.mubr.f32.mxu0 %v4677_v7  ;;  %4069 = vmatpush1.bf16.msra.mxu0 %v4068_v48 }
  0x32   :  { %4071 = vmatprep.subr.bf16.mxu0 %v4070_v49 }
  0x34   :  { %3449 = vmatmul.mubr.msk.f32.gmra.mrb[4].mxu0 %vm83_vm0, %v53_v50 }
  0x35   :  { %327 = vmatprep.mubr.f32.mxu0 %v4677_v7 }
  0x38   :  { %3450 = vmatmul.mubr.msk.f32.gmra.mrb[6].mxu0 %vm83_vm0, %v54_v51 }
  0x39   :  { %333 = vmatprep.mubr.f32.mxu0 %v4677_v7 }
  0x3c   :  { %3451 = vmatmul.mubr.msk.f32.gmra.mrb[8].mxu0 %vm83_vm0, %v55_v52 }
  0x3d   :  { %339 = vmatprep.mubr.f32.mxu0 %v4677_v7 }
  0x40   :  { %3452 = vmatmul.mubr.msk.f32.gmra.mrb[10].mxu0 %vm83_vm0, %v56_v53 }
  0x41   :  { %345 = vmatprep.mubr.f32.mxu0 %v4677_v7 }
  0x44   :  { %3453 = vmatmul.mubr.msk.f32.gmra.mrb[12].mxu0 %vm83_vm0, %v57_v54 }
  0x45   :  { %351 = vmatprep.mubr.f32.mxu0 %v4677_v7 }
  0x48   :  { %3454 = vmatmul.mubr.msk.f32.gmra.mrb[14].mxu0 %vm83_vm0, %v58_v55 }
  0x49   :  { %462 = vmatprep.mubr.f32.mxu0 %v4677_v7 }
  0x4c   :  { %3455 = vmatmul.mubr.msk.f32.vlgmr.msra.gmra.mrb[0].mxu0 %vm83_vm0, %v358_v60 }
  0x4d   :  { %468 = vmatprep.mubr.f32.mxu0 %v4677_v7  ;;  %4073 = vmatpush1.bf16.msra.mxu0 %v4072_v61 }
  0x4e   :  { %4075 = vmatprep.subr.bf16.mxu0 %v4074_v62 }
  0x50   :  { %3456 = vmatmul.mubr.msk.f32.gmra.mrb[2].mxu0 %vm83_vm0, %v359_v3 }
  0x51   :  { %474 = vmatprep.mubr.f32.mxu0 %v4677_v7  ;;  %4077 = vmatpush1.bf16.msra.mxu0 %v4076_v4 }
  0x52   :  { %4079 = vmatprep.subr.bf16.mxu0 %v4078_v5 }
  0x54   :  { %3457 = vmatmul.mubr.msk.f32.gmra.mrb[4].mxu0 %vm83_vm0, %v360_v6 }
  0x55   :  { %480 = vmatprep.mubr.f32.mxu0 %v4677_v7 }
  0x58   :  { %3458 = vmatmul.mubr.msk.f32.gmra.mrb[6].mxu0 %vm83_vm0, %v361_v8 }
  0x59   :  { %486 = vmatprep.mubr.f32.mxu0 %v4677_v7 }
  0x5c   :  { %3459 = vmatmul.mubr.msk.f32.gmra.mrb[8].mxu0 %vm83_vm0, %v362_v9 }
  0x5d   :  { %492 = vmatprep.mubr.f32.mxu0 %v4677_v7 }
  0x60   :  { %3460 = vmatmul.mubr.msk.f32.gmra.mrb[10].mxu0 %vm83_vm0, %v363_v10 }
  0x61   :  { %498 = vmatprep.mubr.f32.mxu0 %v4677_v7 }
  0x64   :  { %3461 = vmatmul.mubr.msk.f32.gmra.mrb[12].mxu0 %vm83_vm0, %v364_v11 }
  0x65   :  { %504 = vmatprep.mubr.f32.mxu0 %v4677_v7 }
  0x68   :  { %3462 = vmatmul.mubr.msk.f32.gmra.mrb[14].mxu0 %vm83_vm0, %v365_v12 }
  0x69   :  { %631 = vmatprep.mubr.f32.mxu0 %v4677_v7 }
  0x6c   :  { %3463 = vmatmul.mubr.msk.f32.vlgmr.msra.gmra.mrb[0].mxu0 %vm83_vm0, %v527_v17 }
  0x6d   :  { %637 = vmatprep.mubr.f32.mxu0 %v4677_v7  ;;  %4081 = vmatpush1.bf16.msra.mxu0 %v4080_v18 }
  0x6e   :  { %4083 = vmatprep.subr.bf16.mxu0 %v4082_v19 }
  0x70   :  { %3464 = vmatmul.mubr.msk.f32.gmra.mrb[2].mxu0 %vm83_vm0, %v528_v22 }
  0x71   :  { %643 = vmatprep.mubr.f32.mxu0 %v4677_v7  ;;  %4085 = vmatpush1.bf16.msra.mxu0 %v4084_v23 }
  0x72   :  { %4238 = vmatprep.subr.bf16.mxu0 %v4678_v38 }
  0x74   :  { %3465 = vmatmul.mubr.msk.f32.gmra.mrb[4].mxu0 %vm83_vm0, %v529_v24 }
  0x75   :  { %649 = vmatprep.mubr.f32.mxu0 %v4677_v7 }
  0x78   :  { %3466 = vmatmul.mubr.msk.f32.gmra.mrb[6].mxu0 %vm83_vm0, %v530_v25 }
  0x79   :  { %655 = vmatprep.mubr.f32.mxu0 %v4677_v7 }
  0x7c   :  { %3467 = vmatmul.mubr.msk.f32.gmra.mrb[8].mxu0 %vm83_vm0, %v531_v26 }
  0x7d   :  { %661 = vmatprep.mubr.f32.mxu0 %v4677_v7 }
  0x80   :  { %3468 = vmatmul.mubr.msk.f32.gmra.mrb[10].mxu0 %vm83_vm0, %v532_v27 }
  0x81   :  { %667 = vmatprep.mubr.f32.mxu0 %v4677_v7 }
  0x84   :  { %3469 = vmatmul.mubr.msk.f32.gmra.mrb[12].mxu0 %vm83_vm0, %v533_v28 }
  0x85   :  { %673 = vmatprep.mubr.f32.mxu0 %v4677_v7 }
  0x88   :  { %3470 = vmatmul.mubr.msk.f32.gmra.mrb[14].mxu0 %vm83_vm0, %v534_v29 }
  0x89   :  { %800 = vmatprep.mubr.f32.mxu0 %v4677_v7 }
  0x8c   :  { %3471 = vmatmul.mubr.msk.f32.vlgmr.msra.gmra.mrb[0].mxu0 %vm83_vm0, %v696_v30 }
  0x8d   :  { %806 = vmatprep.mubr.f32.mxu0 %v4677_v7 }
  0x90   :  { %3472 = vmatmul.mubr.msk.f32.gmra.mrb[2].mxu0 %vm83_vm0, %v697_v31 }
  0x91   :  { %812 = vmatprep.mubr.f32.mxu0 %v4677_v7 }
  0x94   :  { %3473 = vmatmul.mubr.msk.f32.gmra.mrb[4].mxu0 %vm83_vm0, %v698_v32 }
  0x95   :  { %818 = vmatprep.mubr.f32.mxu0 %v4677_v7 }
  0x98   :  { %3474 = vmatmul.mubr.msk.f32.gmra.mrb[6].mxu0 %vm83_vm0, %v699_v33 }
  0x99   :  { %824 = vmatprep.mubr.f32.mxu0 %v4677_v7 }
  0x9c   :  { %3475 = vmatmul.mubr.msk.f32.gmra.mrb[8].mxu0 %vm83_vm0, %v700_v34 }
  0x9d   :  { %830 = vmatprep.mubr.f32.mxu0 %v4677_v7 }
  0xa0   :  { %3476 = vmatmul.mubr.msk.f32.gmra.mrb[10].mxu0 %vm83_vm0, %v701_v35 }
  0xa1   :  { %836 = vmatprep.mubr.f32.mxu0 %v4677_v7 }
  0xa4   :  { %3477 = vmatmul.mubr.msk.f32.gmra.mrb[12].mxu0 %vm83_vm0, %v702_v36 }
  0xa5   :  { %842 = vmatprep.mubr.f32.mxu0 %v4677_v7 }
  0xa8   :  { %3478 = vmatmul.mubr.msk.f32.gmra.mrb[14].mxu0 %vm83_vm0, %v703_v37 }
 0x15f   :  { %v802_v46 = vpop.f32.mrb[0].mxu0 }
 0x160   :  { %v877_v47 = vadd.f32 %v5093_v44, %v802_v46  ;;  %v804_v48 = vpop.f32.mrb[1].mxu0 }
 0x161   :  { %v878_v49 = vadd.f32 %v5097_v45, %v804_v48 }
 0x162   :  { %v893_v50 = vmul.f32 0.6666667, %v877_v47 }
 0x163   :  { %v894_v51 = vmul.f32 0.6666667, %v878_v49  ;;  %v808_v52 = vpop.f32.mrb[2].mxu0 }
 0x164   :  { %v879_v53 = vadd.f32 %v5093_v44, %v808_v52  ;;  %v810_v54 = vpop.f32.mrb[3].mxu0  ;;  %4601 = vtanh.f32 %v893_v50 }
 0x165   :  { %v880_v55 = vadd.f32 %v5097_v45, %v810_v54  ;;  %4603 = vtanh.f32 %v894_v51 }
 0x166   :  { %v895_v56 = vmul.f32 0.6666667, %v879_v53 }
 0x167   :  { %v896_v57 = vmul.f32 0.6666667, %v880_v55  ;;  %v814_v58 = vpop.f32.mrb[4].mxu0 }
 0x168   :  { %4605 = vtanh.f32 %v895_v56  ;;  %v881_v59 = vadd.f32 %v5093_v44, %v814_v58  ;;  %v816_v60 = vpop.f32.mrb[5].mxu0 }
 0x169   :  { %4607 = vtanh.f32 %v896_v57  ;;  %v882_v61 = vadd.f32 %v5097_v45, %v816_v60 }
 0x16a   :  { %v897_v62 = vmul.f32 0.6666667, %v881_v59 }
 0x16b   :  { %v898_v63 = vmul.f32 0.6666667, %v882_v61  ;;  %v820_v0 = vpop.f32.mrb[6].mxu0 }
 0x16c   :  { %v883_v1 = vadd.f32 %v5093_v44, %v820_v0  ;;  %v822_v2 = vpop.f32.mrb[7].mxu0  ;;  %4609 = vtanh.f32 %v897_v62 }
 0x16d   :  { %v884_v3 = vadd.f32 %v5097_v45, %v822_v2  ;;  %4611 = vtanh.f32 %v898_v63 }
 0x16e   :  { %v899_v4 = vmul.f32 0.6666667, %v883_v1  ;;  %v4602_v5 = vpop.eup %4601 }
 0x16f   :  { %v900_v6 = vmul.f32 0.6666667, %v884_v3  ;;  %v826_v8 = vpop.f32.mrb[8].mxu0  ;;  %v4604_v11 = vpop.eup %4603  ;;  %v925_v15 = vmul.f32 1.7159, %v4602_v5 }
 0x170   :  { %4613 = vtanh.f32 %v899_v4  ;;  %v885_v9 = vadd.f32 %v5093_v44, %v826_v8  ;;  %v828_v10 = vpop.f32.mrb[9].mxu0  ;;  %v926_v22 = vmul.f32 1.7159, %v4604_v11 }
 0x171   :  { %4615 = vtanh.f32 %v900_v6  ;;  %v886_v12 = vadd.f32 %v5097_v45, %v828_v10 }
 0x172   :  { %v4606_v13 = vpop.eup %4605  ;;  %v901_v14 = vmul.f32 0.6666667, %v885_v9 }
 0x173   :  { %v4608_v16 = vpop.eup %4607  ;;  %v902_v17 = vmul.f32 0.6666667, %v886_v12  ;;  %v832_v18 = vpop.f32.mrb[10].mxu0  ;;  %v927_v19 = vmul.f32 1.7159, %v4606_v13  ;;  %v1054_v12 = vld [vmem:[%s6236_s4] sm:$0xff] }
 0x174   :  { %v887_v20 = vadd.f32 %v5093_v44, %v832_v18  ;;  %v834_v21 = vpop.f32.mrb[11].mxu0  ;;  %v928_v23 = vmul.f32 1.7159, %v4608_v16  ;;  %4617 = vtanh.f32 %v901_v14  ;;  %v1055_v13 = vld [vmem:[%s6236_s4 + $0x8] sm:$0xff]  ;;  %v941_v14 = vld [vmem:[%s6235_s3] sm:$0xff]  ;;  %v1056_v16 = vld [vmem:[%s6236_s4 + $0x10] sm:$0xff] }
 0x175   :  { %v888_v24 = vadd.f32 %v5097_v45, %v834_v21  ;;  %v4088_v25 = vpack.c.bf16 %v927_v19, %v925_v15  ;;  %4619 = vtanh.f32 %v902_v17  ;;  %v4105_v15 = vpack.c.bf16 %v1055_v13, %v1054_v12  ;;  %v1057_v17 = vld [vmem:[%s6236_s4 + $0x18] sm:$0xff]  ;;  %v942_v18 = vld [vmem:[%s6235_s3 + $0x8] sm:$0xff] }
 0x176   :  { %v903_v26 = vmul.f32 0.6666667, %v887_v20  ;;  %v4086_v27 = vpack.c.bf16 %v928_v23, %v926_v22  ;;  %v4610_v28 = vpop.eup %4609  ;;  %v4108_v19 = vpack.c.bf16 %v1057_v17, %v1056_v16  ;;  %v1058_v20 = vld [vmem:[%s6236_s4 + $0x20] sm:$0xff]  ;;  %v1059_v21 = vld [vmem:[%s6236_s4 + $0x28] sm:$0xff]  ;;  %v943_v22 = vld [vmem:[%s6235_s3 + $0x10] sm:$0xff] }
 0x177   :  { %v904_v29 = vmul.f32 0.6666667, %v888_v24  ;;  %v838_v30 = vpop.f32.mrb[12].mxu0  ;;  %v4612_v33 = vpop.eup %4611  ;;  %v929_v36 = vmul.f32 1.7159, %v4610_v28  ;;  %v4111_v23 = vpack.c.bf16 %v1059_v21, %v1058_v20  ;;  %v1060_v24 = vld [vmem:[%s6236_s4 + $0x30] sm:$0xff] }
 0x178   :  { %4621 = vtanh.f32 %v903_v26  ;;  %v889_v31 = vadd.f32 %v5093_v44, %v838_v30  ;;  %v840_v32 = vpop.f32.mrb[13].mxu0  ;;  %4087 = vmatprep.subr.bf16.mxu1 %v4086_v27  ;;  %v930_v48 = vmul.f32 1.7159, %v4612_v33  ;;  %v944_v26 = vld [vmem:[%s6235_s3 + $0x18] sm:$0xf]  ;;  %v1062_v28 = vld [vmem:[%s6236_s4 + $0x40] sm:$0xff] }
 0x179   :  { %4623 = vtanh.f32 %v904_v29  ;;  %v890_v34 = vadd.f32 %v5097_v45, %v840_v32  ;;  %4089 = vmatpush1.bf16.msra.mxu1 %v4088_v25  ;;  %v1061_v25 = vld [vmem:[%s6236_s4 + $0x38] sm:$0xff]  ;;  %v1063_v29 = vld [vmem:[%s6236_s4 + $0x48] sm:$0xff]  ;;  %v1219_v20 = vld [vmem:[%s6237_s5 + $0x100] sm:$0xff] }
 0x17a   :  { %v4614_v35 = vpop.eup %4613  ;;  %v905_v37 = vmul.f32 0.6666667, %v889_v31  ;;  %v4114_v27 = vpack.c.bf16 %v1061_v25, %v1060_v24  ;;  %v4117_v30 = vpack.c.bf16 %v1063_v29, %v1062_v28  ;;  %v1064_v31 = vld [vmem:[%s6236_s4 + $0x50] sm:$0xff]  ;;  %v1065_v32 = vld [vmem:[%s6236_s4 + $0x58] sm:$0xff]  ;;  %v1273_v28 = vrot.slane %v1219_v20, 4 }
 0x17b   :  { %v4616_v39 = vpop.eup %4615  ;;  %v931_v42 = vmul.f32 1.7159, %v4614_v35  ;;  %v906_v46 = vmul.f32 0.6666667, %v890_v34  ;;  %v844_v47 = vpop.f32.mrb[14].mxu0  ;;  %v4120_v33 = vpack.c.bf16 %v1065_v32, %v1064_v31  ;;  %v1066_v34 = vld [vmem:[%s6236_s4 + $0x60] sm:$0xff] }
 0x17c   :  { %v932_v49 = vmul.f32 1.7159, %v4616_v39  ;;  %v891_v50 = vadd.f32 %v5093_v44, %v844_v47  ;;  %v846_v51 = vpop.f32.mrb[15].mxu0  ;;  %4625 = vtanh.f32 %v905_v37  ;;  %v1067_v35 = vld [vmem:[%s6236_s4 + $0x68] sm:$0xff]  ;;  %v1068_v37 = vld [vmem:[%s6236_s4 + $0x70] sm:$0xff]  ;;  %v1069_v39 = vld [vmem:[%s6236_s4 + $0x78] sm:$0xff] }
 0x17d   :  { %v892_v52 = vadd.f32 %v5097_v45, %v846_v51  ;;  %v4092_v53 = vpack.c.bf16 %v931_v42, %v929_v36  ;;  %4627 = vtanh.f32 %v906_v46  ;;  %v4123_v36 = vpack.c.bf16 %v1067_v35, %v1066_v34  ;;  %v1070_v46 = vld [vmem:[%s6236_s4 + $0x80] sm:$0xff]  ;;  %v1071_v47 = vld [vmem:[%s6236_s4 + $0x88] sm:$0xff] }
 0x17e   :  { %v907_v54 = vmul.f32 0.6666667, %v891_v50  ;;  %v4090_v55 = vpack.c.bf16 %v932_v49, %v930_v48  ;;  %v4618_v57 = vpop.eup %4617  ;;  %v4126_v42 = vpack.c.bf16 %v1069_v39, %v1068_v37  ;;  %v4129_v48 = vpack.c.bf16 %v1071_v47, %v1070_v46  ;;  %v1072_v49 = vld [vmem:[%s6236_s4 + $0x90] sm:$0xff]  ;;  %v1073_v50 = vld [vmem:[%s6236_s4 + $0x98] sm:$0xff] }
 0x17f   :  { %v908_v56 = vmul.f32 0.6666667, %v892_v52  ;;  %v4620_v58 = vpop.eup %4619  ;;  %v933_v61 = vmul.f32 1.7159, %v4618_v57  ;;  %v4132_v51 = vpack.c.bf16 %v1073_v50, %v1072_v49  ;;  %v1074_v52 = vld [vmem:[%s6236_s4 + $0xa0] sm:$0xff]  ;;  %v1224_v49 = vld [vmem:[%s6237_s5 + $0x128] sm:$0xff] }
 0x180   :  { %4629 = vtanh.f32 %v907_v54  ;;  %4091 = vmatprep.subr.bf16.mxu1 %v4090_v55  ;;  %v934_v44 = vmul.f32 1.7159, %v4620_v58  ;;  %v1210_v54 = vld [vmem:[%s6237_s5 + $0xb8] sm:$0xff]  ;;  %v1212_v55 = vld [vmem:[%s6237_s5 + $0xc8] sm:$0xff] }
 0x181   :  { %4631 = vtanh.f32 %v908_v56  ;;  %4093 = vmatpush1.bf16.msra.mxu1 %v4092_v53  ;;  %v1208_v53 = vld [vmem:[%s6237_s5 + $0xa8] sm:$0xf0]  ;;  %v1255_v57 = vrot.slane %v1210_v54, 4  ;;  %v1259_v58 = vrot.slane %v1212_v55, 4 }
 0x182   :  { %v4622_v59 = vpop.eup %4621  ;;  %v1254_v56 = vrot.slane %v1208_v53, 4  ;;  %v1223_v53 = vld [vmem:[%s6237_s5 + $0x120] sm:$0xff] }
 0x183   :  { %v4624_v60 = vpop.eup %4623  ;;  %v935_v62 = vmul.f32 1.7159, %v4622_v59  ;;  %v1281_v55 = vrot.slane %v1223_v53, 4 }
 0x184   :  { %v936_v63 = vmul.f32 1.7159, %v4624_v60  ;;  %v1256_v59 = vsel %vm958_vm1, %v1254_v56, %v1255_v57  ;;  %v1260_v60 = vsel %vm958_vm1, %v1255_v57, %v1259_v58 }
 0x185   :  { %v4096_v0 = vpack.c.bf16 %v935_v62, %v933_v61  ;;  %v4134_v61 = vpack.c.bf16 %v1260_v60, %v1256_v59  ;;  %v1207_v62 = vld [vmem:[%s6237_s5 + $0xa0] sm:$0xf0] }
 0x186   :  { %v4094_v45 = vpack.c.bf16 %v936_v63, %v934_v44  ;;  %v4626_v1 = vpop.eup %4625  ;;  %v1209_v44 = vld [vmem:[%s6237_s5 + $0xb0] sm:$0xff]  ;;  %v1211_v63 = vld [vmem:[%s6237_s5 + $0xc0] sm:$0xff] }
 0x187   :  { %v4628_v2 = vpop.eup %4627  ;;  %v937_v5 = vmul.f32 1.7159, %v4626_v1  ;;  %v1251_v1 = vrot.slane %v1207_v62, 4  ;;  %v1228_v62 = vld [vmem:[%s6237_s5 + $0x148] sm:$0xff] }
 0x188   :  { %4095 = vmatprep.subr.bf16.mxu1 %v4094_v45  ;;  %v938_v8 = vmul.f32 1.7159, %v4628_v2  ;;  %v1216_v45 = vld [vmem:[%s6237_s5 + $0xe8] sm:$0xff]  ;;  %v1252_v2 = vrot.slane %v1209_v44, 4 }
 0x189   :  { %4097 = vmatpush1.bf16.msra.mxu1 %v4096_v0  ;;  %v1214_v0 = vld [vmem:[%s6237_s5 + $0xd8] sm:$0xff] }
 0x18a   :  { %v4630_v3 = vpop.eup %4629  ;;  %v1253_v12 = vsel %vm958_vm1, %v1251_v1, %v1252_v2  ;;  %v1227_v1 = vld [vmem:[%s6237_s5 + $0x140] sm:$0xff] }
 0x18b   :  { %v4632_v4 = vpop.eup %4631  ;;  %v939_v6 = vmul.f32 1.7159, %v4630_v3  ;;  %v1257_v3 = vrot.slane %v1211_v63, 4 }
 0x18c   :  { %v940_v9 = vmul.f32 1.7159, %v4632_v4  ;;  %v1213_v4 = vld [vmem:[%s6237_s5 + $0xd0] sm:$0xff] }
 0x18d   :  { %v4101_v10 = vpack.c.bf16 %v939_v6, %v937_v5  ;;  %v1263_v5 = vrot.slane %v1214_v0, 4  ;;  %v1267_v6 = vrot.slane %v1216_v45, 4  ;;  %v1258_v13 = vsel %vm958_vm1, %v1252_v2, %v1257_v3  ;;  %v1225_v45 = vld [vmem:[%s6237_s5 + $0x130] sm:$0xff] }
 0x18e   :  { %v4098_v11 = vpack.c.bf16 %v940_v9, %v938_v8  ;;  %v1215_v8 = vld [vmem:[%s6237_s5 + $0xe0] sm:$0xff]  ;;  %v1218_v9 = vld [vmem:[%s6237_s5 + $0xf8] sm:$0xff]  ;;  %v1291_v0 = vrot.slane %v1228_v62, 4  ;;  %v1285_v2 = vrot.slane %v1225_v45, 4 }
 0x18f   :  { %v1268_v16 = vsel %vm958_vm1, %v1263_v5, %v1267_v6  ;;  %v1271_v17 = vrot.slane %v1218_v9, 4  ;;  %v1512_v62 = vld [vmem:[%s6237_s5 + $0x160] sm:$0xff] }
 0x190   :  { %4100 = vmatprep.subr.msk.bf16.mxu1 %vm4099_vm3, %v4098_v11  ;;  %v1261_v11 = vrot.slane %v1213_v4, 4 }
 0x191   :  { %4103 = vmatpush1.bf16.msk.msra.mxu1 %vm4099_vm3, %v4101_v10  ;;  %v1220_v10 = vld [vmem:[%s6237_s5 + $0x108] sm:$0xff]  ;;  %v1272_v29 = vsel %vm958_vm1, %v1267_v6, %v1271_v17 }
 0x192   :  { %4104 = vmatprep.subr.bf16.mxu1 %v4678_v38 }
 0x194   :  { %3481 = vmatmul.mubr.msk.f32.vlgmr.msra.gmra.mrb[0].mxu1 %vm945_vm4, %v941_v14  ;;  %v1265_v14 = vrot.slane %v1215_v8, 4  ;;  %v1286_v8 = vsel %vm958_vm1, %v1281_v55, %v1285_v2 }
 0x195   :  { %1035 = vmatprep.mubr.f32.mxu1 %v4677_v7  ;;  %4106 = vmatpush1.bf16.msra.mxu1 %v4105_v15  ;;  %v1264_v15 = vsel %vm958_vm1, %v1259_v58, %v1263_v5 }
 0x196   :  { %4107 = vmatprep.subr.bf16.mxu1 %v4678_v38  ;;  %v4138_v25 = vpack.c.bf16 %v1268_v16, %v1264_v15 }
 0x198   :  { %3482 = vmatmul.mubr.msk.f32.gmra.mrb[2].mxu1 %vm945_vm4, %v942_v18  ;;  %v1275_v18 = vrot.slane %v1220_v10, 4 }
 0x199   :  { %1041 = vmatprep.mubr.f32.mxu1 %v4677_v7  ;;  %4109 = vmatpush1.bf16.msra.mxu1 %v4108_v19  ;;  %v1217_v19 = vld [vmem:[%s6237_s5 + $0xf0] sm:$0xff] }
 0x19a   :  { %4110 = vmatprep.subr.bf16.mxu1 %v4678_v38 }
 0x19c   :  { %3483 = vmatmul.mubr.msk.f32.gmra.mrb[4].mxu1 %vm945_vm4, %v943_v22  ;;  %v4136_v22 = vpack.c.bf16 %v1258_v13, %v1253_v12  ;;  %v1185_v12 = vld [vmem:[%s6237_s5 + $0x18] sm:$0xff] }
 0x19d   :  { %1047 = vmatprep.mubr.f32.mxu1 %v4677_v7  ;;  %4112 = vmatpush1.bf16.msra.mxu1 %v4111_v23  ;;  %v1262_v23 = vsel %vm958_vm1, %v1257_v3, %v1261_v11  ;;  %v1289_v3 = vrot.slane %v1227_v1, 4 }
 0x19e   :  { %4113 = vmatprep.subr.bf16.mxu1 %v4678_v38 }
 0x19f   :  { %v1290_v9 = vsel %vm958_vm1, %v1285_v2, %v1289_v3 }
 0x1a0   :  { %3484 = vmatmul.mubr.msk.f32.gmra.mrb[6].mxu1 %vm945_vm4, %v944_v26  ;;  %v1266_v26 = vsel %vm958_vm1, %v1261_v11, %v1265_v14  ;;  %v4152_v10 = vpack.c.bf16 %v1290_v9, %v1286_v8  ;;  %v1183_v11 = vld [vmem:[%s6237_s5 + $0x8] sm:$0xff] }
 0x1a1   :  { %4115 = vmatpush1.bf16.msra.mxu1 %v4114_v27  ;;  %v1269_v27 = vrot.slane %v1217_v19, 4  ;;  %v4140_v32 = vpack.c.bf16 %v1266_v26, %v1262_v23  ;;  %v4154_v13 = vpack.c.bf16 %v1185_v12, %v1183_v11  ;;  %v1184_v19 = vld [vmem:[%s6237_s5 + $0x10] sm:$0xff]  ;;  %v1186_v26 = vld [vmem:[%s6237_s5 + $0x20] sm:$0xff]  ;;  %v1521_v8 = vld [vmem:[%s6237_s5 + $0x1a8] sm:$0xff] }
 0x1a2   :  { %4116 = vmatprep.subr.bf16.mxu1 %v4678_v38  ;;  %v1518_v11 = vld [vmem:[%s6237_s5 + $0x190] sm:$0xff]  ;;  %v1520_v12 = vld [vmem:[%s6237_s5 + $0x1a0] sm:$0xff] }
 0x1a3   :  { %v1270_v35 = vsel %vm958_vm1, %v1265_v14, %v1269_v27 }
 0x1a5   :  { %4118 = vmatpush1.bf16.msra.mxu1 %v4117_v30  ;;  %v1276_v30 = vsel %vm958_vm1, %v1271_v17, %v1275_v18 }
 0x1a6   :  { %4119 = vmatprep.subr.bf16.mxu1 %v4678_v38  ;;  %v4142_v34 = vpack.c.bf16 %v1276_v30, %v1272_v29  ;;  %v1191_v30 = vld [vmem:[%s6237_s5 + $0x48] sm:$0xff] }
 0x1a9   :  { %4121 = vmatpush1.bf16.msra.mxu1 %v4120_v33 }
 0x1aa   :  { %4122 = vmatprep.subr.bf16.mxu1 %v4678_v38 }
 0x1ad   :  { %4124 = vmatpush1.bf16.msra.mxu1 %v4123_v36  ;;  %v1274_v36 = vsel %vm958_vm1, %v1269_v27, %v1273_v28  ;;  %v1188_v27 = vld [vmem:[%s6237_s5 + $0x30] sm:$0xff] }
 0x1ae   :  { %4125 = vmatprep.subr.bf16.mxu1 %v4678_v38  ;;  %v4144_v39 = vpack.c.bf16 %v1274_v36, %v1270_v35  ;;  %v1190_v35 = vld [vmem:[%s6237_s5 + $0x40] sm:$0xff]  ;;  %v1192_v36 = vld [vmem:[%s6237_s5 + $0x50] sm:$0xff] }
 0x1b1   :  { %4127 = vmatpush1.bf16.msra.mxu1 %v4126_v42 }
 0x1b2   :  { %4128 = vmatprep.subr.bf16.mxu1 %v4678_v38 }
 0x1b5   :  { %4130 = vmatpush1.bf16.msra.mxu1 %v4129_v48  ;;  %v1222_v48 = vld [vmem:[%s6237_s5 + $0x118] sm:$0xff] }
 0x1b6   :  { %4131 = vmatprep.subr.bf16.mxu1 %v4678_v38  ;;  %v1279_v50 = vrot.slane %v1222_v48, 4  ;;  %v1194_v48 = vld [vmem:[%s6237_s5 + $0x60] sm:$0xff] }
 0x1b8   :  { %v1280_v56 = vsel %vm958_vm1, %v1275_v18, %v1279_v50  ;;  %v1182_v18 = vld [vmem:[%s6237_s5] sm:$0xff] }
 0x1b9   :  { %4133 = vmatpush1.bf16.msra.mxu1 %v4132_v51  ;;  %v1283_v51 = vrot.slane %v1224_v49, 4  ;;  %v1196_v49 = vld [vmem:[%s6237_s5 + $0x70] sm:$0xff] }
 0x1ba   :  { %1128 = vmatprep.subr.mxu1 %v4677_v7  ;;  %v4168_v53 = vpack.c.bf16 %v1196_v49, %v1194_v48  ;;  %v1645_v49 = vld [vmem:[%s6237_s5 + $0x220] sm:$0xff] }
 0x1bb   :  { %v1284_v57 = vsel %vm958_vm1, %v1279_v50, %v1283_v51 }
 0x1bc   :  { %v4146_v58 = vpack.c.bf16 %v1284_v57, %v1280_v56  ;;  %v1200_v56 = vld [vmem:[%s6237_s5 + $0x90] sm:$0xff] }
 0x1bd   :  { %1129 = vmatpush1.msra.mxu1 %v1074_v52  ;;  %v1221_v52 = vld [vmem:[%s6237_s5 + $0x110] sm:$0xff] }
 0x1be   :  { %4135 = vmatprep.subr.bf16.mxu1 %v4134_v61  ;;  %v1277_v54 = vrot.slane %v1221_v52, 4  ;;  %v1226_v61 = vld [vmem:[%s6237_s5 + $0x138] sm:$0xff] }
 0x1bf   :  { %v1287_v63 = vrot.slane %v1226_v61, 4  ;;  %v1201_v52 = vld [vmem:[%s6237_s5 + $0x98] sm:$0xff]  ;;  %v1510_v61 = vld [vmem:[%s6237_s5 + $0x150] sm:$0xff] }
 0x1c0   :  { %v1278_v59 = vsel %vm958_vm1, %v1273_v28, %v1277_v54  ;;  %v1282_v60 = vsel %vm958_vm1, %v1277_v54, %v1281_v55  ;;  %v1198_v55 = vld [vmem:[%s6237_s5 + $0x80] sm:$0xff]  ;;  %v4176_v1 = vpack.c.bf16 %v1512_v62, %v1510_v61  ;;  %v1693_v61 = vrot.slane %v1645_v49, 4 }
 0x1c1   :  { %v4148_v44 = vpack.c.bf16 %v1282_v60, %v1278_v59  ;;  %v1288_v4 = vsel %vm958_vm1, %v1283_v51, %v1287_v63  ;;  %v1292_v5 = vsel %vm958_vm1, %v1287_v63, %v1291_v0  ;;  %v1199_v51 = vld [vmem:[%s6237_s5 + $0x88] sm:$0xff]  ;;  %v4172_v57 = vpack.c.bf16 %v1200_v56, %v1198_v55  ;;  %v1511_v59 = vld [vmem:[%s6237_s5 + $0x158] sm:$0xff] }
 0x1c2   :  { %v4150_v6 = vpack.c.bf16 %v1292_v5, %v1288_v4  ;;  %v4170_v54 = vpack.c.bf16 %v1201_v52, %v1199_v51  ;;  %v1513_v60 = vld [vmem:[%s6237_s5 + $0x168] sm:$0xff]  ;;  %v1516_v4 = vld [vmem:[%s6237_s5 + $0x180] sm:$0xff] }
 0x1c3   :  { %v1517_v63 = vld [vmem:[%s6237_s5 + $0x188] sm:$0xff]  ;;  %v4174_v45 = vpack.c.bf16 %v1513_v60, %v1511_v59 }
 0x1c4   :  { %v1650_v52 = vld [vmem:[%s6237_s5 + $0x248] sm:$0xff] }
 0x267   :  { %v1031_v21 = vpop.f32.mrb[0].mxu1 }
 0x268   :  { %v1033_v24 = vpop.f32.mrb[1].mxu1 }
 0x269   :  { %3485 = vmatprep.mubr.msk.f32.mxu1 %vm1075_vm5, %v1033_v24  ;;  %v4156_v24 = vpack.c.bf16 %v1184_v19, %v1182_v18  ;;  %v4184_v18 = vpack.c.bf16 %v1520_v12, %v1518_v11  ;;  %v1527_v19 = vld [vmem:[%s6237_s5 + $0x1d8] sm:$0xff] }
 0x26a   :  { %1153 = vmatmul.mubr.f32.vlgmr.msra.gmra.mrb[8].mxu1 %v1031_v21  ;;  %v1187_v21 = vld [vmem:[%s6237_s5 + $0x28] sm:$0xff] }
 0x26b   :  { %v1037_v31 = vpop.f32.mrb[2].mxu1  ;;  %4137 = vmatpush1.bf16.msra.mxu1 %v4136_v22  ;;  %v1189_v22 = vld [vmem:[%s6237_s5 + $0x38] sm:$0xff] }
 0x26c   :  { %v1039_v33 = vpop.f32.mrb[3].mxu1  ;;  %4139 = vmatprep.subr.bf16.mxu1 %v4138_v25  ;;  %v4158_v25 = vpack.c.bf16 %v1189_v22, %v1187_v21  ;;  %v1640_v21 = vld [vmem:[%s6237_s5 + $0x1f8] sm:$0xf0] }
 0x26d   :  { %3486 = vmatprep.mubr.msk.f32.mxu1 %vm1075_vm5, %v1039_v33  ;;  %v4160_v33 = vpack.c.bf16 %v1188_v27, %v1186_v26  ;;  %v1639_v27 = vld [vmem:[%s6237_s5 + $0x1f0] sm:$0xf0] }
 0x26e   :  { %1158 = vmatmul.mubr.f32.gmra.mrb[10].mxu1 %v1037_v31  ;;  %v1193_v31 = vld [vmem:[%s6237_s5 + $0x58] sm:$0xff] }
 0x26f   :  { %v1043_v37 = vpop.f32.mrb[4].mxu1  ;;  %4141 = vmatpush1.bf16.msra.mxu1 %v4140_v32 }
 0x270   :  { %v1045_v42 = vpop.f32.mrb[5].mxu1  ;;  %4143 = vmatprep.subr.bf16.mxu1 %v4142_v34  ;;  %v4162_v34 = vpack.c.bf16 %v1193_v31, %v1191_v30  ;;  %v1648_v30 = vld [vmem:[%s6237_s5 + $0x238] sm:$0xff] }
 0x271   :  { %3487 = vmatprep.mubr.msk.f32.mxu1 %vm1075_vm5, %v1045_v42  ;;  %v1197_v42 = vld [vmem:[%s6237_s5 + $0x78] sm:$0xff]  ;;  %v1699_v48 = vrot.slane %v1648_v30, 4 }
 0x272   :  { %1163 = vmatmul.mubr.f32.gmra.mrb[12].mxu1 %v1043_v37 }
 0x273   :  { %v1049_v46 = vpop.f32.mrb[6].mxu1  ;;  %4145 = vmatpush1.bf16.msra.mxu1 %v4144_v39  ;;  %v1195_v39 = vld [vmem:[%s6237_s5 + $0x68] sm:$0xff] }
 0x274   :  { %v1051_v47 = vpop.f32.mrb[7].mxu1  ;;  %4147 = vmatprep.subr.bf16.mxu1 %v4146_v58  ;;  %v1203_v58 = vld [vmem:[%s6237_s5 + $0xa8] sm:$0xf] }
 0x275   :  { %3488 = vmatprep.mubr.msk.f32.mxu1 %vm1075_vm5, %v1051_v47  ;;  %v4166_v47 = vpack.c.bf16 %v1197_v42, %v1195_v39  ;;  %v1683_v39 = vrot.slane %v1639_v27, 4 }
 0x276   :  { %1168 = vmatmul.mubr.f32.gmra.mrb[14].mxu1 %v1049_v46  ;;  %v4164_v46 = vpack.c.bf16 %v1192_v36, %v1190_v35  ;;  %v1526_v35 = vld [vmem:[%s6237_s5 + $0x1d0] sm:$0xff]  ;;  %v1528_v36 = vld [vmem:[%s6237_s5 + $0x1e0] sm:$0xff] }
 0x277   :  { %1390 = vmatprep.mubr.f32.mxu1 %v4677_v7  ;;  %4149 = vmatpush1.bf16.msra.mxu1 %v4148_v44  ;;  %v1515_v44 = vld [vmem:[%s6237_s5 + $0x178] sm:$0xff]  ;;  %v4192_v51 = vpack.c.bf16 %v1528_v36, %v1526_v35 }
 0x278   :  { %4151 = vmatprep.subr.bf16.mxu1 %v4150_v6  ;;  %v4178_v2 = vpack.c.bf16 %v1517_v63, %v1515_v44  ;;  %v1519_v6 = vld [vmem:[%s6237_s5 + $0x198] sm:$0xff]  ;;  %v1703_v44 = vrot.slane %v1650_v52, 4 }
 0x27a   :  { %v1704_v12 = vsel %vm958_vm1, %v1699_v48, %v1703_v44 }
 0x27b   :  { %4153 = vmatpush1.bf16.msra.mxu1 %v4152_v10  ;;  %v4182_v10 = vpack.c.bf16 %v1521_v8, %v1519_v6 }
 0x27c   :  { %3489 = vmatprep.subr.msk.mxu1 %vm958_vm1, %v1291_v0  ;;  %v1202_v0 = vld [vmem:[%s6237_s5 + $0xa0] sm:$0xf] }
 0x27f   :  { %3490 = vmatpush1.msk.msra.mxu1 %vm958_vm1, %v1289_v3  ;;  %v1514_v3 = vld [vmem:[%s6237_s5 + $0x170] sm:$0xff] }
 0x280   :  { %4155 = vmatprep.subr.bf16.mxu1 %v4154_v13  ;;  %v4180_v9 = vpack.c.bf16 %v1516_v4, %v1514_v3  ;;  %v1530_v3 = vld [vmem:[%s6237_s5 + $0x1f0] sm:$0xf] }
 0x33d   :  { %v1154_v14 = vpop.f32.mrb[8].mxu1 }
 0x33e   :  { %1174 = vst.msk [vmem:[#allocation2] sm:$0xff] %vm1173_vm6, %v1154_v14  ;;  %v1156_v15 = vpop.f32.mrb[9].mxu1  ;;  %v1523_v14 = vld [vmem:[%s6237_s5 + $0x1b8] sm:$0xff] }
 0x33f   :  { %v1525_v15 = vld [vmem:[%s6237_s5 + $0x1c8] sm:$0xff] }
 0x340   :  { %v4186_v22 = vpack.c.bf16 %v1525_v15, %v1523_v14 }
 0x341   :  { %v1159_v16 = vpop.f32.mrb[10].mxu1 }
 0x342   :  { %1175 = vst.msk [vmem:[#allocation2 + $0x8] sm:$0xff] %vm1173_vm6, %v1159_v16  ;;  %v1161_v17 = vpop.f32.mrb[11].mxu1  ;;  %v1522_v16 = vld [vmem:[%s6237_s5 + $0x1b0] sm:$0xff] }
 0x343   :  { %v1524_v17 = vld [vmem:[%s6237_s5 + $0x1c0] sm:$0xff] }
 0x344   :  { %v4188_v31 = vpack.c.bf16 %v1524_v17, %v1522_v16  ;;  %v1653_v17 = vld [vmem:[%s6237_s5 + $0x260] sm:$0xff] }
 0x345   :  { %v1164_v20 = vpop.f32.mrb[12].mxu1  ;;  %v1179_v5 = vld [vmem:[#allocation2] sm:$0xff]  ;;  %v1709_v27 = vrot.slane %v1653_v17, 4 }
 0x346   :  { %1176 = vst.msk [vmem:[#allocation2 + $0x10] sm:$0xff] %vm1173_vm6, %v1164_v20  ;;  %v1166_v23 = vpop.f32.mrb[13].mxu1  ;;  %v1529_v20 = vld [vmem:[%s6237_s5 + $0x1e8] sm:$0xff] }
 0x347   :  { %v1642_v23 = vld [vmem:[%s6237_s5 + $0x208] sm:$0xff] }
 0x349   :  { %v1204_v28 = vld [vmem:[#allocation2 + $0x1] sm:$0xff]  ;;  %v1169_v29 = vpop.f32.mrb[14].mxu1 }
 0x34a   :  { %3491 = vmatmul.mubr.msk.f32.vlgmr.msra.gmra.mrb[16].mxu1 %vm1173_vm6, %v1204_v28  ;;  %1178 = vst.msk [vmem:[#allocation2 + $0x18] sm:$0xf] %vm1177_vm7, %v1169_v29  ;;  %v1171_v32 = vpop.f32.mrb[15].mxu1  ;;  %v1180_v13 = vld [vmem:[#allocation2 + $0x8] sm:$0xff]  ;;  %v1643_v28 = vld [vmem:[%s6237_s5 + $0x210] sm:$0xff] }
 0x34b   :  { %4157 = vmatpush1.bf16.msra.mxu1 %v4156_v24  ;;  %1396 = vmatprep.mubr.f32.mxu1 %v4677_v7  ;;  %v1644_v24 = vld [vmem:[%s6237_s5 + $0x218] sm:$0xff]  ;;  %v1646_v29 = vld [vmem:[%s6237_s5 + $0x228] sm:$0xff]  ;;  %v4190_v32 = vpack.c.bf16 %v1529_v20, %v1527_v19 }
 0x34c   :  { %4159 = vmatprep.subr.bf16.mxu1 %v4158_v25  ;;  %v1641_v25 = vld [vmem:[%s6237_s5 + $0x200] sm:$0xff]  ;;  %v1658_v20 = vld [vmem:[%s6237_s5 + $0x288] sm:$0xff] }
 0x34d   :  { %v1205_v37 = vld [vmem:[#allocation2 + $0x9] sm:$0xff]  ;;  %v1684_v42 = vrot.slane %v1641_v25, 4  ;;  %v1719_v30 = vrot.slane %v1658_v20, 4 }
 0x34e   :  { %3492 = vmatmul.mubr.msk.f32.gmra.mrb[18].mxu1 %vm1173_vm6, %v1205_v37  ;;  %v1181_v26 = vld [vmem:[#allocation2 + $0x10] sm:$0xff]  ;;  %v1691_v37 = vrot.slane %v1644_v24, 4  ;;  %v1507_v16 = vld [vmem:[#allocation2 + $0x2] sm:$0xff] }
 0x34f   :  { %4161 = vmatpush1.bf16.msra.mxu1 %v4160_v33  ;;  %1402 = vmatprep.mubr.f32.mxu1 %v4677_v7  ;;  %v1686_v33 = vrot.slane %v1640_v21, 4  ;;  %v1685_v56 = vsel %vm958_vm1, %v1683_v39, %v1684_v42  ;;  %v1660_v21 = vld [vmem:[%s6237_s5 + $0x298] sm:$0xff]  ;;  %v1868_v20 = vld [vmem:[%s6237_s5 + $0x330] sm:$0xff] }
 0x350   :  { %4163 = vmatprep.subr.bf16.mxu1 %v4162_v34  ;;  %v1687_v34 = vrot.slane %v1642_v23, 4 }
 0x351   :  { %v1206_v50 = vld [vmem:[#allocation2 + $0x11] sm:$0xff] }
 0x352   :  { %3493 = vmatmul.mubr.msk.f32.gmra.mrb[20].mxu1 %vm1173_vm6, %v1206_v50  ;;  %v1647_v50 = vld [vmem:[%s6237_s5 + $0x230] sm:$0xff]  ;;  %v1692_v55 = vsel %vm958_vm1, %v1687_v34, %v1691_v37 }
 0x353   :  { %4165 = vmatpush1.bf16.msra.mxu1 %v4164_v46  ;;  %1488 = vmatprep.mubr.f32.mxu1 %v4677_v7  ;;  %v1689_v46 = vrot.slane %v1643_v28, 4  ;;  %v1697_v62 = vrot.slane %v1647_v50, 4 }
 0x354   :  { %4167 = vmatprep.subr.bf16.mxu1 %v4166_v47  ;;  %v1695_v47 = vrot.slane %v1646_v29, 4  ;;  %v1508_v29 = vld [vmem:[#allocation2 + $0xa] sm:$0xff] }
 0x355   :  { %v1694_v8 = vsel %vm958_vm1, %v1689_v46, %v1693_v61 }
 0x356   :  { %v1696_v59 = vsel %vm958_vm1, %v1691_v37, %v1695_v47  ;;  %v1700_v60 = vsel %vm958_vm1, %v1695_v47, %v1699_v48 }
 0x357   :  { %4169 = vmatpush1.bf16.msra.mxu1 %v4168_v53  ;;  %v1652_v53 = vld [vmem:[%s6237_s5 + $0x258] sm:$0xff]  ;;  %v4198_v6 = vpack.c.bf16 %v1700_v60, %v1696_v59 }
 0x358   :  { %4171 = vmatprep.subr.bf16.mxu1 %v4170_v54  ;;  %v1688_v54 = vsel %vm958_vm1, %v1686_v33, %v1687_v34  ;;  %v1707_v63 = vrot.slane %v1652_v53, 4  ;;  %v1659_v33 = vld [vmem:[%s6237_s5 + $0x290] sm:$0xff]  ;;  %v1857_v59 = vld [vmem:[%s6237_s5 + $0x2d8] sm:$0xff] }
 0x359   :  { %v4194_v4 = vpack.c.bf16 %v1692_v55, %v1688_v54  ;;  %v1851_v54 = vld [vmem:[%s6237_s5 + $0x2a8] sm:$0xff]  ;;  %v1853_v55 = vld [vmem:[%s6237_s5 + $0x2b8] sm:$0xff] }
 0x35a   :  { %v4214_v60 = vpack.c.bf16 %v1853_v55, %v1851_v54  ;;  %v2112_v54 = vld [vmem:[%s6240_s8 + $0x70] sm:$0xff]  ;;  %v2113_v55 = vld [vmem:[%s6240_s8 + $0x78] sm:$0xff] }
 0x35b   :  { %4173 = vmatpush1.bf16.msra.mxu1 %v4172_v57  ;;  %v1690_v57 = vsel %vm958_vm1, %v1684_v42, %v1689_v46  ;;  %v1721_v42 = vrot.slane %v1659_v33, 4  ;;  %v1509_v46 = vld [vmem:[#allocation2 + $0x12] sm:$0xff]  ;;  %v2102_v33 = vld [vmem:[%s6240_s8 + $0x20] sm:$0xff] }
 0x35c   :  { %3494 = vmatprep.subr.msk.mxu1 %vm958_vm1, %v1203_v58  ;;  %v1531_v58 = vld [vmem:[%s6237_s5 + $0x1f8] sm:$0xf] }
 0x35f   :  { %3495 = vmatpush1.msk.msra.mxu1 %vm958_vm1, %v1202_v0  ;;  %v1649_v0 = vld [vmem:[%s6237_s5 + $0x240] sm:$0xff] }
 0x360   :  { %3496 = vmatmul.mubr.msk.f32.vlgmr.msra.gmra.mrb[16].mxu1 %vm1173_vm6, %v1179_v5  ;;  %4175 = vmatprep.subr.bf16.mxu1 %v4174_v45  ;;  %v1651_v45 = vld [vmem:[%s6237_s5 + $0x250] sm:$0xff]  ;;  %v4196_v5 = vpack.c.bf16 %v1690_v57, %v1685_v56  ;;  %v1850_v56 = vld [vmem:[%s6237_s5 + $0x2a0] sm:$0xff] }
 0x361   :  { %4177 = vmatpush1.bf16.msra.mxu1 %v4176_v1  ;;  %1494 = vmatprep.mubr.f32.mxu1 %v4677_v7  ;;  %v1654_v1 = vld [vmem:[%s6237_s5 + $0x268] sm:$0xff]  ;;  %v1705_v11 = vrot.slane %v1651_v45, 4  ;;  %v1852_v57 = vld [vmem:[%s6237_s5 + $0x2b0] sm:$0xff] }
 0x362   :  { %4179 = vmatprep.subr.bf16.mxu1 %v4178_v2  ;;  %v1656_v2 = vld [vmem:[%s6237_s5 + $0x278] sm:$0xff]  ;;  %v1711_v14 = vrot.slane %v1654_v1, 4  ;;  %v1859_v45 = vld [vmem:[%s6237_s5 + $0x2e8] sm:$0xff] }
 0x363   :  { %v1715_v15 = vrot.slane %v1656_v2, 4  ;;  %v1710_v36 = vsel %vm958_vm1, %v1705_v11, %v1709_v27  ;;  %v1861_v1 = vld [vmem:[%s6237_s5 + $0x2f8] sm:$0xff] }
 0x364   :  { %3497 = vmatmul.mubr.msk.f32.gmra.mrb[18].mxu1 %vm1173_vm6, %v1180_v13  ;;  %v1708_v13 = vsel %vm958_vm1, %v1703_v44, %v1707_v63  ;;  %v1712_v25 = vsel %vm958_vm1, %v1707_v63, %v1711_v14  ;;  %v1854_v44 = vld [vmem:[%s6237_s5 + $0x2c0] sm:$0xff]  ;;  %v1856_v63 = vld [vmem:[%s6237_s5 + $0x2d0] sm:$0xff] }
 0x365   :  { %4181 = vmatpush1.bf16.msra.mxu1 %v4180_v9  ;;  %1500 = vmatprep.mubr.f32.mxu1 %v4677_v7  ;;  %v1698_v9 = vsel %vm958_vm1, %v1693_v61, %v1697_v62  ;;  %v1720_v47 = vsel %vm958_vm1, %v1715_v15, %v1719_v30  ;;  %v4216_v61 = vpack.c.bf16 %v1852_v57, %v1850_v56  ;;  %v2114_v57 = vld [vmem:[%s6240_s8 + $0x80] sm:$0xff] }
 0x366   :  { %4183 = vmatprep.subr.bf16.mxu1 %v4182_v10  ;;  %v1701_v10 = vrot.slane %v1649_v0, 4  ;;  %v4200_v19 = vpack.c.bf16 %v1698_v9, %v1694_v8  ;;  %v1636_v0 = vld [vmem:[#allocation2 + $0x3] sm:$0xff]  ;;  %v4220_v2 = vpack.c.bf16 %v1856_v63, %v1854_v44  ;;  %v1865_v9 = vld [vmem:[%s6237_s5 + $0x318] sm:$0xff]  ;;  %v4260_v56 = vpack.c.bf16 %v2113_v55, %v2112_v54 }
 0x367   :  { %v1863_v8 = vld [vmem:[%s6237_s5 + $0x308] sm:$0xff]  ;;  %v2632_v55 = vld [vmem:[%s6243_s11] sm:$0xff] }
 0x368   :  { %3498 = vmatmul.mubr.msk.f32.gmra.mrb[20].mxu1 %vm1173_vm6, %v1181_v26  ;;  %v1702_v23 = vsel %vm958_vm1, %v1697_v62, %v1701_v10  ;;  %v1706_v24 = vsel %vm958_vm1, %v1701_v10, %v1705_v11  ;;  %v1716_v26 = vsel %vm958_vm1, %v1711_v14, %v1715_v15  ;;  %v4226_v11 = vpack.c.bf16 %v1865_v9, %v1863_v8  ;;  %v1638_v14 = vld [vmem:[#allocation2 + $0x13] sm:$0xff]  ;;  %v1867_v15 = vld [vmem:[%s6237_s5 + $0x328] sm:$0xff] }
 0x369   :  { %4185 = vmatpush1.bf16.msra.mxu1 %v4184_v18  ;;  %1611 = vmatprep.mubr.f32.mxu1 %v4677_v7  ;;  %v1655_v18 = vld [vmem:[%s6237_s5 + $0x270] sm:$0xff]  ;;  %v4204_v34 = vpack.c.bf16 %v1706_v24, %v1702_v23  ;;  %v4206_v35 = vpack.c.bf16 %v1716_v26, %v1712_v25  ;;  %v1870_v23 = vld [vmem:[%s6237_s5 + $0x340] sm:$0xf]  ;;  %v1847_v24 = vld [vmem:[#allocation2 + $0x4] sm:$0xff] }
 0x36a   :  { %4187 = vmatprep.subr.bf16.mxu1 %v4186_v22  ;;  %v4202_v22 = vpack.c.bf16 %v1708_v13, %v1704_v12  ;;  %v1713_v28 = vrot.slane %v1655_v18, 4  ;;  %v1862_v12 = vld [vmem:[%s6237_s5 + $0x300] sm:$0xff]  ;;  %v1864_v13 = vld [vmem:[%s6237_s5 + $0x310] sm:$0xff] }
 0x36b   :  { %v4228_v17 = vpack.c.bf16 %v1864_v13, %v1862_v12  ;;  %v1848_v25 = vld [vmem:[#allocation2 + $0xc] sm:$0xff]  ;;  %v1849_v26 = vld [vmem:[#allocation2 + $0x14] sm:$0xff] }
 0x36c   :  { %v1714_v37 = vsel %vm958_vm1, %v1709_v27, %v1713_v28  ;;  %v2098_v27 = vld [vmem:[%s6240_s8] sm:$0xff] }
 0x36d   :  { %4189 = vmatpush1.bf16.msra.mxu1 %v4188_v31  ;;  %v1723_v31 = vrot.slane %v1660_v21, 4  ;;  %v4208_v49 = vpack.c.bf16 %v1714_v37, %v1710_v36  ;;  %v2104_v36 = vld [vmem:[%s6240_s8 + $0x30] sm:$0xff]  ;;  %v2105_v37 = vld [vmem:[%s6240_s8 + $0x38] sm:$0xff] }
 0x36e   :  { %4191 = vmatprep.subr.bf16.mxu1 %v4190_v32  ;;  %v1657_v32 = vld [vmem:[%s6237_s5 + $0x280] sm:$0xff] }
 0x36f   :  { %v1717_v39 = vrot.slane %v1657_v32, 4  ;;  %v1724_v48 = vsel %vm958_vm1, %v1719_v30, %v1723_v31 }
 0x370   :  { %v4210_v50 = vpack.c.bf16 %v1724_v48, %v1720_v47  ;;  %v2108_v48 = vld [vmem:[%s6240_s8 + $0x50] sm:$0xff] }
 0x371   :  { %4193 = vmatpush1.bf16.msra.mxu1 %v4192_v51  ;;  %v1718_v51 = vsel %vm958_vm1, %v1713_v28, %v1717_v39  ;;  %v1722_v52 = vsel %vm958_vm1, %v1717_v39, %v1721_v42  ;;  %v2099_v28 = vld [vmem:[%s6240_s8 + $0x8] sm:$0xff]  ;;  %v4248_v39 = vpack.c.bf16 %v2105_v37, %v2104_v36  ;;  %v2209_v37 = vld [vmem:[%s6241_s9 + $0x20] sm:$0xff] }
 0x372   :  { %3499 = vmatprep.subr.msk.mxu1 %vm958_vm1, %v1531_v58  ;;  %v4212_v53 = vpack.c.bf16 %v1722_v52, %v1718_v51  ;;  %v1855_v58 = vld [vmem:[%s6237_s5 + $0x2c8] sm:$0xff]  ;;  %v4239_v30 = vpack.c.bf16 %v2099_v28, %v2098_v27  ;;  %v2110_v51 = vld [vmem:[%s6240_s8 + $0x60] sm:$0xff]  ;;  %v2116_v28 = vld [vmem:[%s6240_s8 + $0x90] sm:$0xff] }
 0x373   :  { %v4218_v62 = vpack.c.bf16 %v1857_v59, %v1855_v58  ;;  %v2111_v52 = vld [vmem:[%s6240_s8 + $0x68] sm:$0xff]  ;;  %v2012_v27 = vld [vmem:[%s6239_s7] sm:$0xff] }
 0x374   :  { %4240 = vmatpush1.bf16.msra.mxu0 %v4239_v30  ;;  %v2115_v58 = vld [vmem:[%s6240_s8 + $0x88] sm:$0xff] }
 0x375   :  { %3500 = vmatpush1.msk.msra.mxu1 %vm958_vm1, %v1530_v3  ;;  %v4222_v3 = vpack.c.bf16 %v1861_v1, %v1859_v45  ;;  %4241 = vmatprep.subr.bf16.mxu0 %v4678_v38  ;;  %v4263_v59 = vpack.c.bf16 %v2115_v58, %v2114_v57  ;;  %v2634_v57 = vld [vmem:[%s6243_s11 + $0x10] sm:$0xff] }
 0x376   :  { %3501 = vmatmul.mubr.msk.f32.vlgmr.msra.gmra.mrb[16].mxu1 %vm1173_vm6, %v1507_v16  ;;  %4195 = vmatprep.subr.bf16.mxu1 %v4194_v4  ;;  %v1858_v4 = vld [vmem:[%s6237_s5 + $0x2e0] sm:$0xff]  ;;  %v1869_v16 = vld [vmem:[%s6237_s5 + $0x338] sm:$0xff] }
 0x377   :  { %4197 = vmatpush1.bf16.msra.mxu1 %v4196_v5  ;;  %1617 = vmatprep.mubr.f32.mxu1 %v4677_v7  ;;  %v1860_v5 = vld [vmem:[%s6237_s5 + $0x2f0] sm:$0xff]  ;;  %v4230_v18 = vpack.c.bf16 %v1869_v16, %v1867_v15 }
 0x378   :  { %4199 = vmatprep.subr.bf16.mxu1 %v4198_v6  ;;  %v1637_v6 = vld [vmem:[#allocation2 + $0xb] sm:$0xff]  ;;  %v4224_v10 = vpack.c.bf16 %v1860_v5, %v1858_v4 }
 0x37a   :  { %3502 = vmatmul.mubr.msk.f32.gmra.mrb[18].mxu1 %vm1173_vm6, %v1508_v29  ;;  %v2100_v29 = vld [vmem:[%s6240_s8 + $0x10] sm:$0xff] }
 0x37b   :  { %4201 = vmatpush1.bf16.msra.mxu1 %v4200_v19  ;;  %1623 = vmatprep.mubr.f32.mxu1 %v4677_v7  ;;  %v1866_v19 = vld [vmem:[%s6237_s5 + $0x320] sm:$0xff] }
 0x37c   :  { %4203 = vmatprep.subr.bf16.mxu1 %v4202_v22  ;;  %v4232_v21 = vpack.c.bf16 %v1868_v20, %v1866_v19  ;;  %v1871_v22 = vld [vmem:[%s6237_s5 + $0x348] sm:$0xf] }
 0x37e   :  { %3503 = vmatmul.mubr.msk.f32.gmra.mrb[20].mxu1 %vm1173_vm6, %v1509_v46  ;;  %v2107_v46 = vld [vmem:[%s6240_s8 + $0x48] sm:$0xff] }
 0x37f   :  { %4205 = vmatpush1.bf16.msra.mxu1 %v4204_v34  ;;  %1822 = vmatprep.mubr.f32.mxu1 %v4677_v7  ;;  %v2103_v34 = vld [vmem:[%s6240_s8 + $0x28] sm:$0xff] }
 0x380   :  { %4207 = vmatprep.subr.bf16.mxu1 %v4206_v35  ;;  %v4245_v35 = vpack.c.bf16 %v2103_v34, %v2102_v33  ;;  %v2207_v33 = vld [vmem:[%s6241_s9 + $0x10] sm:$0xff] }
 0x383   :  { %4209 = vmatpush1.bf16.msra.mxu1 %v4208_v49  ;;  %v2109_v49 = vld [vmem:[%s6240_s8 + $0x58] sm:$0xff] }
 0x384   :  { %4211 = vmatprep.subr.bf16.mxu1 %v4210_v50  ;;  %v4254_v50 = vpack.c.bf16 %v2109_v49, %v2108_v48  ;;  %v2211_v48 = vld [vmem:[%s6241_s9 + $0x30] sm:$0xff]  ;;  %v2212_v49 = vld [vmem:[%s6241_s9 + $0x38] sm:$0xff] }
 0x387   :  { %4213 = vmatpush1.bf16.msra.mxu1 %v4212_v53  ;;  %v4257_v53 = vpack.c.bf16 %v2111_v52, %v2110_v51  ;;  %v2013_v51 = vld [vmem:[%s6239_s7 + $0x8] sm:$0x3]  ;;  %v2213_v52 = vld [vmem:[%s6241_s9 + $0x40] sm:$0xff] }
 0x388   :  { %3504 = vmatprep.subr.msk.mxu1 %vm958_vm1, %v1723_v31  ;;  %v2101_v31 = vld [vmem:[%s6240_s8 + $0x18] sm:$0xff] }
 0x389   :  { %v4242_v32 = vpack.c.bf16 %v2101_v31, %v2100_v29  ;;  %v2117_v29 = vld [vmem:[%s6240_s8 + $0x98] sm:$0xff]  ;;  %v2205_v31 = vld [vmem:[%s6241_s9] sm:$0xff] }
 0x38a   :  { %v4266_v30 = vpack.c.bf16 %v2117_v29, %v2116_v28  ;;  %v2384_v28 = vld [vmem:[%s6241_s9 + $0xe8] sm:$0xff] }
 0x38b   :  { %3505 = vmatpush1.msk.msra.mxu1 %vm958_vm1, %v1721_v42  ;;  %4243 = vmatpush1.bf16.msra.mxu0 %v4242_v32  ;;  %v2106_v42 = vld [vmem:[%s6240_s8 + $0x40] sm:$0xff]  ;;  %v2206_v32 = vld [vmem:[%s6241_s9 + $0x8] sm:$0xff] }
 0x38c   :  { %3506 = vmatmul.mubr.msk.f32.vlgmr.msra.gmra.mrb[16].mxu1 %vm1173_vm6, %v1636_v0  ;;  %4215 = vmatprep.subr.bf16.mxu1 %v4214_v60  ;;  %v4251_v47 = vpack.c.bf16 %v2107_v46, %v2106_v42  ;;  %v1976_v60 = vld [vmem:[%s6238_s6] sm:$0x3]  ;;  %v5719_v34 = vpack.c.bf16 %v2206_v32, %v2205_v31  ;;  %v2461_v31 = vld [vmem:[%s6241_s9 + $0xf8] sm:$0xff] }
 0x38d   :  { %4217 = vmatpush1.bf16.msra.mxu1 %v4216_v61  ;;  %1828 = vmatprep.mubr.f32.mxu1 %v4677_v7  ;;  %v1981_v61 = vrot.slane %v1976_v60, %v869_v41 }
 0x38e   :  { %4219 = vmatprep.subr.bf16.mxu1 %v4218_v62  ;;  %4244 = vmatprep.subr.bf16.mxu0 %v4678_v38  ;;  %v1985_v62 = vrot.slane %v1976_v60, %v873_v43 }
 0x38f   :  { %4246 = vmatpush1.bf16.msra.mxu0 %v4245_v35  ;;  %v2208_v35 = vld [vmem:[%s6241_s9 + $0x18] sm:$0xff] }
 0x390   :  { %3507 = vmatmul.mubr.msk.f32.gmra.mrb[18].mxu1 %vm1173_vm6, %v1637_v6  ;;  %4247 = vmatprep.subr.bf16.mxu0 %v4678_v38  ;;  %v5725_v36 = vpack.c.bf16 %v2208_v35, %v2207_v33  ;;  %v2462_v33 = vld [vmem:[%s6241_s9 + $0x100] sm:$0xff]  ;;  %v2463_v35 = vld [vmem:[%s6241_s9 + $0x108] sm:$0xff] }
 0x391   :  { %4221 = vmatpush1.bf16.msra.mxu1 %v4220_v2  ;;  %1834 = vmatprep.mubr.f32.mxu1 %v4677_v7 }
 0x392   :  { %4223 = vmatprep.subr.bf16.mxu1 %v4222_v3 }
 0x393   :  { %4249 = vmatpush1.bf16.msra.mxu0 %v4248_v39  ;;  %v2210_v39 = vld [vmem:[%s6241_s9 + $0x28] sm:$0xff] }
 0x394   :  { %3508 = vmatmul.mubr.msk.f32.gmra.mrb[20].mxu1 %vm1173_vm6, %v1638_v14  ;;  %4250 = vmatprep.subr.bf16.mxu0 %v4678_v38  ;;  %v5735_v42 = vpack.c.bf16 %v2210_v39, %v2209_v37  ;;  %v5920_v39 = vpack.c.bf16 %v2463_v35, %v2462_v33 }
 0x395   :  { %4225 = vmatpush1.bf16.msra.mxu1 %v4224_v10  ;;  %1951 = vmatprep.mubr.f32.mxu1 %v4677_v7 }
 0x396   :  { %4227 = vmatprep.subr.bf16.mxu1 %v4226_v11 }
 0x397   :  { %4252 = vmatpush1.bf16.msra.mxu0 %v4251_v47 }
 0x398   :  { %4253 = vmatprep.subr.bf16.mxu0 %v4678_v38 }
 0x399   :  { %4229 = vmatpush1.bf16.msra.mxu1 %v4228_v17 }
 0x39a   :  { %4231 = vmatprep.subr.bf16.mxu1 %v4230_v18 }
 0x39b   :  { %4255 = vmatpush1.bf16.msra.mxu0 %v4254_v50  ;;  %v5747_v50 = vpack.c.bf16 %v2212_v49, %v2211_v48  ;;  %v2466_v49 = vld [vmem:[%s6241_s9 + $0x120] sm:$0xff] }
 0x39c   :  { %4256 = vmatprep.subr.bf16.mxu0 %v4678_v38 }
 0x39d   :  { %4233 = vmatpush1.bf16.msra.mxu1 %v4232_v21 }
 0x39e   :  { %3509 = vmatprep.subr.msk.mxu1 %vm958_vm1, %v1871_v22 }
 0x39f   :  { %4258 = vmatpush1.bf16.msra.mxu0 %v4257_v53  ;;  %v2214_v53 = vld [vmem:[%s6241_s9 + $0x48] sm:$0xff] }
 0x3a0   :  { %4259 = vmatprep.subr.bf16.mxu0 %v4678_v38  ;;  %v5761_v54 = vpack.c.bf16 %v2214_v53, %v2213_v52  ;;  %v2468_v53 = vld [vmem:[%s6241_s9 + $0x130] sm:$0xff] }
 0x3a1   :  { %3510 = vmatpush1.msk.msra.mxu1 %vm958_vm1, %v1870_v23 }
 0x3a2   :  { %3511 = vmatmul.mubr.msk.f32.vlgmr.msra.gmra.mrb[16].mxu1 %vm1173_vm6, %v1847_v24 }
 0x3a3   :  { %1957 = vmatprep.mubr.f32.mxu1 %v4677_v7  ;;  %4261 = vmatpush1.bf16.msra.mxu0 %v4260_v56  ;;  %v2633_v56 = vld [vmem:[%s6243_s11 + $0x8] sm:$0xff] }
 0x3a4   :  { %4262 = vmatprep.subr.bf16.mxu0 %v4678_v38  ;;  %v5776_v58 = vpack.c.bf16 %v2633_v56, %v2632_v55  ;;  %v2469_v55 = vld [vmem:[%s6241_s9 + $0x138] sm:$0xff] }
 0x3a5   :  { %v5952_v56 = vpack.c.bf16 %v2469_v55, %v2468_v53  ;;  %v2726_v53 = vld [vmem:[%s6245_s13 + $0x8] sm:$0xff] }
 0x3a6   :  { %3512 = vmatmul.mubr.msk.f32.gmra.mrb[18].mxu1 %vm1173_vm6, %v1848_v25 }
 0x3a7   :  { %1963 = vmatprep.mubr.f32.mxu1 %v4677_v7  ;;  %4264 = vmatpush1.bf16.msra.mxu0 %v4263_v59  ;;  %v2635_v59 = vld [vmem:[%s6243_s11 + $0x18] sm:$0xff] }
 0x3a8   :  { %4265 = vmatprep.subr.bf16.mxu0 %v4678_v38  ;;  %v5782_v60 = vpack.c.bf16 %v2635_v59, %v2634_v57  ;;  %v2545_v57 = vld [vmem:[%s6241_s9 + $0x140] sm:$0xff]  ;;  %v2546_v59 = vld [vmem:[%s6241_s9 + $0x148] sm:$0xff] }
 0x3aa   :  { %3513 = vmatmul.mubr.msk.f32.gmra.mrb[20].mxu1 %vm1173_vm6, %v1849_v26 }
 0x3ab   :  { %2085 = vmatprep.mubr.f32.mxu1 %v4677_v7  ;;  %4267 = vmatpush1.bf16.msra.mxu0 %v4266_v30  ;;  %v2460_v30 = vld [vmem:[%s6241_s9 + $0xf0] sm:$0xff] }
 0x3ac   :  { %4343 = vmatprep.subr.bf16.mxu0 %v4678_v38  ;;  %v5909_v32 = vpack.c.bf16 %v2461_v31, %v2460_v30  ;;  %v2646_v30 = vld [vmem:[%s6243_s11 + $0x70] sm:$0xff]  ;;  %v2203_v31 = vld [vmem:[%s6242_s10] sm:$0x1] }
 0x475   :  { %v1953_v44 = vpop.f32.mrb[16].mxu1 }
 0x476   :  { %v1988_v63 = vadd.f32 %v1981_v61, %v1953_v44  ;;  %v1955_v0 = vpop.f32.mrb[17].mxu1 }
 0x477   :  { %v1989_v45 = vadd.f32 %v1985_v62, %v1955_v0 }
 0x478   :  { %v1994_v1 = vmul.f32 0.6666667, %v1988_v63 }
 0x479   :  { %v1995_v2 = vmul.f32 0.6666667, %v1989_v45  ;;  %v1959_v3 = vpop.f32.mrb[18].mxu1  ;;  %v2290_v45 = vld [vmem:[%s6241_s9 + $0x50] sm:$0xff] }
 0x47a   :  { %v1990_v4 = vadd.f32 %v1981_v61, %v1959_v3  ;;  %v1961_v5 = vpop.f32.mrb[19].mxu1  ;;  %4633 = vtanh.f32 %v1994_v1  ;;  %v2291_v1 = vld [vmem:[%s6241_s9 + $0x58] sm:$0xff]  ;;  %v2292_v3 = vld [vmem:[%s6241_s9 + $0x60] sm:$0xff] }
 0x47b   :  { %v1991_v6 = vadd.f32 %v1985_v62, %v1961_v5  ;;  %4635 = vtanh.f32 %v1995_v2  ;;  %v5804_v2 = vpack.c.bf16 %v2291_v1, %v2290_v45  ;;  %v2549_v1 = vld [vmem:[%s6241_s9 + $0x160] sm:$0xff] }
 0x47c   :  { %v1996_v8 = vmul.f32 0.6666667, %v1990_v4  ;;  %v2293_v4 = vld [vmem:[%s6241_s9 + $0x68] sm:$0xff] }
 0x47d   :  { %v1997_v9 = vmul.f32 0.6666667, %v1991_v6  ;;  %v1965_v10 = vpop.f32.mrb[20].mxu1  ;;  %v5814_v6 = vpack.c.bf16 %v2293_v4, %v2292_v3  ;;  %v2550_v3 = vld [vmem:[%s6241_s9 + $0x168] sm:$0xff] }
 0x47e   :  { %4637 = vtanh.f32 %v1996_v8  ;;  %v1992_v41 = vadd.f32 %v1981_v61, %v1965_v10  ;;  %v1967_v11 = vpop.f32.mrb[21].mxu1  ;;  %v2636_v61 = vld [vmem:[%s6243_s11 + $0x20] sm:$0xff]  ;;  %v2294_v8 = vld [vmem:[%s6241_s9 + $0x70] sm:$0xff]  ;;  %v5985_v4 = vpack.c.bf16 %v2550_v3, %v2549_v1  ;;  %v2730_v3 = vld [vmem:[%s6245_s13 + $0x28] sm:$0xff] }
 0x47f   :  { %4639 = vtanh.f32 %v1997_v9  ;;  %v1993_v40 = vadd.f32 %v1985_v62, %v1967_v11  ;;  %v2637_v62 = vld [vmem:[%s6243_s11 + $0x28] sm:$0xff]  ;;  %v2295_v9 = vld [vmem:[%s6241_s9 + $0x78] sm:$0xff]  ;;  %v2729_v1 = vld [vmem:[%s6245_s13 + $0x20] sm:$0xff] }
 0x480   :  { %v1998_v43 = vmul.f32 0.6666667, %v1992_v41  ;;  %v5792_v44 = vpack.c.bf16 %v2637_v62, %v2636_v61  ;;  %v5826_v10 = vpack.c.bf16 %v2295_v9, %v2294_v8  ;;  %v2296_v41 = vld [vmem:[%s6241_s9 + $0x80] sm:$0xff]  ;;  %v2297_v11 = vld [vmem:[%s6241_s9 + $0x88] sm:$0xff]  ;;  %v5962_v61 = vpack.c.bf16 %v2546_v59, %v2545_v57  ;;  %v2547_v62 = vld [vmem:[%s6241_s9 + $0x150] sm:$0xff] }
 0x481   :  { %v1999_v12 = vmul.f32 0.6666667, %v1993_v40  ;;  %v5836_v40 = vpack.c.bf16 %v2297_v11, %v2296_v41  ;;  %v2552_v8 = vld [vmem:[%s6241_s9 + $0x178] sm:$0xff]  ;;  %v2553_v41 = vld [vmem:[%s6241_s9 + $0x180] sm:$0xff]  ;;  %v2554_v11 = vld [vmem:[%s6241_s9 + $0x188] sm:$0xff] }
 0x483   :  { %4641 = vtanh.f32 %v1999_v12  ;;  %v2299_v12 = vld [vmem:[%s6241_s9 + $0x98] sm:$0xff] }
 0x484   :  { %4643 = vtanh.f32 %v1998_v43  ;;  %v4634_v13 = vpop.eup %4633  ;;  %v2298_v43 = vld [vmem:[%s6241_s9 + $0x90] sm:$0xff] }
 0x485   :  { %v4636_v14 = vpop.eup %4635  ;;  %v2006_v17 = vmul.f32 1.7159, %v4634_v13  ;;  %v5846_v13 = vpack.c.bf16 %v2299_v12, %v2298_v43  ;;  %v6005_v43 = vpack.c.bf16 %v2554_v11, %v2553_v41  ;;  %v2732_v41 = vld [vmem:[%s6245_s13 + $0x38] sm:$0xff] }
 0x486   :  { %v2007_v19 = vmul.f32 1.7159, %v4636_v14  ;;  %v2375_v14 = vld [vmem:[%s6241_s9 + $0xa0] sm:$0xff] }
 0x488   :  { %v4638_v15 = vpop.eup %4637 }
 0x489   :  { %v4640_v16 = vpop.eup %4639  ;;  %v2008_v18 = vmul.f32 1.7159, %v4638_v15  ;;  %v2376_v15 = vld [vmem:[%s6241_s9 + $0xa8] sm:$0xff] }
 0x48a   :  { %v2009_v20 = vmul.f32 1.7159, %v4640_v16  ;;  %v5856_v16 = vpack.c.bf16 %v2376_v15, %v2375_v14 }
 0x48b   :  { %v4236_v21 = vpack.c.bf16 %v2008_v18, %v2006_v17  ;;  %v2377_v17 = vld [vmem:[%s6241_s9 + $0xb0] sm:$0xff]  ;;  %v2378_v18 = vld [vmem:[%s6241_s9 + $0xb8] sm:$0xff] }
 0x48c   :  { %v4234_v22 = vpack.c.bf16 %v2009_v20, %v2007_v19  ;;  %v5867_v20 = vpack.c.bf16 %v2378_v18, %v2377_v17  ;;  %v2638_v17 = vld [vmem:[%s6243_s11 + $0x30] sm:$0xff] }
 0x48d   :  { %v4642_v23 = vpop.eup %4641 }
 0x48e   :  { %v4644_v24 = vpop.eup %4643  ;;  %4235 = vmatprep.subr.bf16.mxu1 %v4234_v22  ;;  %v2011_v25 = vmul.f32 1.7159, %v4642_v23  ;;  %v2380_v22 = vld [vmem:[%s6241_s9 + $0xc8] sm:$0xff] }
 0x48f   :  { %4237 = vmatpush1.bf16.msra.mxu1 %v4236_v21  ;;  %v2010_v26 = vmul.f32 1.7159, %v4644_v24  ;;  %v2379_v21 = vld [vmem:[%s6241_s9 + $0xc0] sm:$0xff]  ;;  %v2381_v24 = vld [vmem:[%s6241_s9 + $0xd0] sm:$0xff] }
 0x490   :  { %2025 = vmatprep.subr.mxu1 %v2011_v25  ;;  %v5879_v23 = vpack.c.bf16 %v2380_v22, %v2379_v21  ;;  %v2382_v25 = vld [vmem:[%s6241_s9 + $0xd8] sm:$0xff]  ;;  %v2642_v21 = vld [vmem:[%s6243_s11 + $0x50] sm:$0xff] }
 0x491   :  { %v2643_v22 = vld [vmem:[%s6243_s11 + $0x58] sm:$0xff] }
 0x493   :  { %2026 = vmatpush1.msra.mxu1 %v2010_v26  ;;  %v5889_v26 = vpack.c.bf16 %v2382_v25, %v2381_v24  ;;  %v4359_v24 = vpack.c.bf16 %v2643_v22, %v2642_v21  ;;  %v2644_v25 = vld [vmem:[%s6243_s11 + $0x60] sm:$0xff] }
 0x494   :  { %3514 = vmatmul.mubr.msk.f32.vlgmr.msra.gmra.mrb[22].mxu1 %vm2014_vm8, %v2012_v27  ;;  %4268 = vmatprep.subr.bf16.mxu1 %v4678_v38  ;;  %v2383_v27 = vld [vmem:[%s6241_s9 + $0xe0] sm:$0xff] }
 0x495   :  { %2091 = vmatprep.mubr.f32.mxu1 %v4677_v7  ;;  %4270 = vmatpush3.bf16.msra.mxu1 %v5719_v34  ;;  %v5899_v29 = vpack.c.bf16 %v2384_v28, %v2383_v27  ;;  %v2645_v27 = vld [vmem:[%s6243_s11 + $0x68] sm:$0xff] }
 0x496   :  { %4271 = vmatprep.subr.bf16.mxu1 %v4678_v38  ;;  %v4362_v28 = vpack.c.bf16 %v2645_v27, %v2644_v25 }
 0x498   :  { %3515 = vmatmul.mubr.msk.f32.gmra.mrb[24].mxu1 %vm2014_vm8, %v2013_v51  ;;  %v2467_v51 = vld [vmem:[%s6241_s9 + $0x128] sm:$0xff] }
 0x499   :  { %4273 = vmatpush3.bf16.msra.mxu1 %v5725_v36  ;;  %3720 = vmatprep.mubr.msk.f32.mxu1 %vm4680_vm9, %v4677_v7  ;;  %v5942_v52 = vpack.c.bf16 %v2467_v51, %v2466_v49  ;;  %v2725_v51 = vld [vmem:[%s6245_s13] sm:$0xff] }
 0x49a   :  { %4274 = vmatprep.subr.bf16.mxu1 %v4678_v38  ;;  %v6068_v57 = vpack.c.bf16 %v2726_v53, %v2725_v51 }
 0x49d   :  { %4276 = vmatpush3.bf16.msra.mxu1 %v5735_v42 }
 0x49e   :  { %4277 = vmatprep.subr.bf16.mxu1 %v4678_v38 }
 0x4a1   :  { %4279 = vmatpush3.bf16.msra.mxu1 %v5747_v50 }
 0x4a2   :  { %4280 = vmatprep.subr.bf16.mxu1 %v4678_v38 }
 0x4a5   :  { %4282 = vmatpush3.bf16.msra.mxu1 %v5761_v54 }
 0x4a6   :  { %4283 = vmatprep.subr.bf16.mxu1 %v4678_v38 }
 0x567   :  { %v2087_v46 = vpop.f32.mrb[22].mxu1 }
 0x568   :  { %v2089_v47 = vpop.f32.mrb[23].mxu1 }
 0x569   :  { %3516 = vmatprep.mubr.msk.f32.mxu0 %vm83_vm0, %v2089_v47  ;;  %v2465_v47 = vld [vmem:[%s6241_s9 + $0x118] sm:$0xff] }
 0x56a   :  { %2189 = vmatmul.mubr.f32.vlgmr.msra.gmra.mrb[16].mxu0 %v2087_v46  ;;  %v2464_v46 = vld [vmem:[%s6241_s9 + $0x110] sm:$0xff] }
 0x56b   :  { %4345 = vmatpush3.bf16.msra.mxu0 %v5776_v58  ;;  %v5932_v48 = vpack.c.bf16 %v2465_v47, %v2464_v46  ;;  %v2093_v12 = vpop.f32.mrb[24].mxu1 }
 0x56c   :  { %4346 = vmatprep.subr.bf16.mxu0 %v4678_v38  ;;  %v2095_v14 = vpop.f32.mrb[25].mxu1 }
 0x56d   :  { %3517 = vmatprep.mubr.msk.f32.mxu0 %vm83_vm0, %v2095_v14  ;;  %v2734_v14 = vld [vmem:[%s6245_s13 + $0x48] sm:$0xff] }
 0x56e   :  { %2194 = vmatmul.mubr.f32.gmra.mrb[18].mxu0 %v2093_v12  ;;  %v2733_v12 = vld [vmem:[%s6245_s13 + $0x40] sm:$0xff] }
 0x56f   :  { %4348 = vmatpush3.bf16.msra.mxu0 %v5782_v60  ;;  %3845 = vmatprep.mubr.msk.f32.mxu0 %vm4680_vm9, %v4677_v7 }
 0x570   :  { %4349 = vmatprep.subr.bf16.mxu0 %v4678_v38 }
 0x573   :  { %4351 = vmatpush3.bf16.msra.mxu0 %v5792_v44 }
 0x574   :  { %4352 = vmatprep.subr.bf16.mxu0 %v4678_v38 }
 0x63d   :  { %v2190_v63 = vpop.f32.mrb[16].mxu0 }
 0x63e   :  { %2200 = vst.msk [vmem:[#allocation3] sm:$0xff] %vm2199_vm10, %v2190_v63  ;;  %v2192_v0 = vpop.f32.mrb[17].mxu0  ;;  %v2548_v63 = vld [vmem:[%s6241_s9 + $0x158] sm:$0xff] }
 0x63f   :  { %v5973_v45 = vpack.c.bf16 %v2548_v63, %v2547_v62  ;;  %v2727_v62 = vld [vmem:[%s6245_s13 + $0x10] sm:$0xff]  ;;  %v2728_v63 = vld [vmem:[%s6245_s13 + $0x18] sm:$0xff] }
 0x641   :  { %v2195_v33 = vpop.f32.mrb[18].mxu0 }
 0x642   :  { %2202 = vst.msk [vmem:[#allocation3 + $0x8] sm:$0x3] %vm2201_vm11, %v2195_v33 }
 0x645   :  { %v2204_v5 = vld [vmem:[#allocation3] sm:$0x1]  ;;  %v2289_v19 = vld [vmem:[#allocation3 + $0x1] sm:$0x1]  ;;  %v2374_v37 = vld [vmem:[#allocation3 + $0x2] sm:$0x1] }
 0x646   :  { %3721 = vmatmul.mubr.msk.f32.vlgmr.msra.gmra.mrb[26].mxu1 %vm2199_vm10, %v2204_v5  ;;  %v2459_v0 = vld [vmem:[#allocation3 + $0x3] sm:$0x1]  ;;  %v2551_v5 = vld [vmem:[%s6241_s9 + $0x170] sm:$0xff]  ;;  %v2544_v15 = vld [vmem:[#allocation3 + $0x4] sm:$0x1] }
 0x647   :  { %4285 = vmatpush3.bf16.msra.mxu1 %v5804_v2  ;;  %3743 = vmatprep.mubr.msk.f32.mxu1 %vm4680_vm9, %v4677_v7  ;;  %v5995_v9 = vpack.c.bf16 %v2552_v8, %v2551_v5  ;;  %v6091_v5 = vpack.c.bf16 %v2730_v3, %v2729_v1  ;;  %v2731_v8 = vld [vmem:[%s6245_s13 + $0x30] sm:$0xff] }
 0x648   :  { %4286 = vmatprep.subr.bf16.mxu1 %v4678_v38  ;;  %v6101_v11 = vpack.c.bf16 %v2732_v41, %v2731_v8 }
 0x64b   :  { %4288 = vmatpush3.bf16.msra.mxu1 %v5814_v6 }
 0x64c   :  { %4289 = vmatprep.subr.bf16.mxu1 %v4678_v38 }
 0x64f   :  { %4291 = vmatpush3.bf16.msra.mxu1 %v5826_v10 }
 0x650   :  { %4292 = vmatprep.subr.bf16.mxu1 %v4678_v38 }
 0x653   :  { %4294 = vmatpush3.bf16.msra.mxu1 %v5836_v40 }
 0x654   :  { %4295 = vmatprep.subr.bf16.mxu1 %v4678_v38 }
 0x657   :  { %4297 = vmatpush3.bf16.msra.mxu1 %v5846_v13 }
 0x658   :  { %4298 = vmatprep.subr.bf16.mxu1 %v4678_v38 }
 0x65a   :  { %3744 = vmatmul.mubr.msk.f32.vlgmr.msra.gmra.mrb[26].mxu1 %vm2199_vm10, %v2289_v19 }
 0x65b   :  { %4300 = vmatpush3.bf16.msra.mxu1 %v5856_v16  ;;  %3766 = vmatprep.mubr.msk.f32.mxu1 %vm4680_vm9, %v4677_v7 }
 0x65c   :  { %4301 = vmatprep.subr.bf16.mxu1 %v4678_v38 }
 0x65f   :  { %4303 = vmatpush3.bf16.msra.mxu1 %v5867_v20 }
 0x660   :  { %4304 = vmatprep.subr.bf16.mxu1 %v4678_v38 }
 0x663   :  { %4306 = vmatpush3.bf16.msra.mxu1 %v5879_v23 }
 0x664   :  { %4307 = vmatprep.subr.bf16.mxu1 %v4678_v38 }
 0x667   :  { %4309 = vmatpush3.bf16.msra.mxu1 %v5889_v26 }
 0x668   :  { %4310 = vmatprep.subr.bf16.mxu1 %v4678_v38 }
 0x66b   :  { %4312 = vmatpush3.bf16.msra.mxu1 %v5899_v29 }
 0x66c   :  { %4313 = vmatprep.subr.bf16.mxu1 %v4678_v38 }
 0x66e   :  { %3767 = vmatmul.mubr.msk.f32.vlgmr.msra.gmra.mrb[26].mxu1 %vm2199_vm10, %v2374_v37  ;;  %v2197_v37 = vpop.f32.mrb[19].mxu0 }
 0x66f   :  { %4315 = vmatpush3.bf16.msra.mxu1 %v5909_v32  ;;  %3789 = vmatprep.mubr.msk.f32.mxu1 %vm4680_vm9, %v4677_v7 }
 0x670   :  { %4316 = vmatprep.subr.bf16.mxu1 %v4678_v38 }
 0x673   :  { %4318 = vmatpush3.bf16.msra.mxu1 %v5920_v39 }
 0x674   :  { %4319 = vmatprep.subr.bf16.mxu1 %v4678_v38 }
 0x677   :  { %4321 = vmatpush3.bf16.msra.mxu1 %v5932_v48 }
 0x678   :  { %4322 = vmatprep.subr.bf16.mxu1 %v4678_v38 }
 0x67b   :  { %4324 = vmatpush3.bf16.msra.mxu1 %v5942_v52 }
 0x67c   :  { %4325 = vmatprep.subr.bf16.mxu1 %v4678_v38 }
 0x67f   :  { %4327 = vmatpush3.bf16.msra.mxu1 %v5952_v56 }
 0x680   :  { %4328 = vmatprep.subr.bf16.mxu1 %v4678_v38 }
 0x682   :  { %3790 = vmatmul.mubr.msk.f32.vlgmr.msra.gmra.mrb[26].mxu1 %vm2199_vm10, %v2459_v0  ;;  %v6081_v0 = vpack.c.bf16 %v2728_v63, %v2727_v62 }
 0x683   :  { %4330 = vmatpush3.bf16.msra.mxu1 %v5962_v61  ;;  %3812 = vmatprep.mubr.msk.f32.mxu1 %vm4680_vm9, %v4677_v7 }
 0x684   :  { %4331 = vmatprep.subr.bf16.mxu1 %v4678_v38 }
 0x687   :  { %4333 = vmatpush3.bf16.msra.mxu1 %v5973_v45 }
 0x688   :  { %4334 = vmatprep.subr.bf16.mxu1 %v4678_v38 }
 0x68b   :  { %4336 = vmatpush3.bf16.msra.mxu1 %v5985_v4 }
 0x68c   :  { %4337 = vmatprep.subr.bf16.mxu1 %v4678_v38 }
 0x68f   :  { %4339 = vmatpush3.bf16.msra.mxu1 %v5995_v9 }
 0x690   :  { %4340 = vmatprep.subr.bf16.mxu1 %v4678_v38 }
 0x693   :  { %4342 = vmatpush3.bf16.msra.mxu1 %v6005_v43 }
 0x694   :  { %4454 = vmatprep.subr.bf16.mxu1 %v4678_v38 }
 0x696   :  { %3813 = vmatmul.mubr.msk.f32.vlgmr.msra.gmra.mrb[26].mxu1 %vm2199_vm10, %v2544_v15  ;;  %v6111_v15 = vpack.c.bf16 %v2734_v14, %v2733_v12 }
 0x697   :  { %4456 = vmatpush3.bf16.msra.mxu1 %v5776_v58  ;;  %4018 = vmatprep.mubr.msk.f32.mxu1 %vm4680_vm9, %v4677_v7  ;;  %v2639_v58 = vld [vmem:[%s6243_s11 + $0x38] sm:$0xff] }
 0x698   :  { %4457 = vmatprep.subr.bf16.mxu1 %v4678_v38  ;;  %v4353_v18 = vpack.c.bf16 %v2639_v58, %v2638_v17  ;;  %v2735_v17 = vld [vmem:[%s6245_s13 + $0x50] sm:$0xf]  ;;  %v2647_v58 = vld [vmem:[%s6244_s12] sm:$0x1] }
 0x69a   :  { %4354 = vmatpush3.bf16.msra.mxu0 %v4353_v18 }
 0x69b   :  { %4459 = vmatpush3.bf16.msra.mxu1 %v5782_v60  ;;  %4355 = vmatprep.subr.bf16.mxu0 %v4678_v38  ;;  %v2640_v60 = vld [vmem:[%s6243_s11 + $0x40] sm:$0xff] }
 0x69c   :  { %4460 = vmatprep.subr.bf16.mxu1 %v4678_v38 }
 0x69f   :  { %4462 = vmatpush3.bf16.msra.mxu1 %v5792_v44  ;;  %v2641_v44 = vld [vmem:[%s6243_s11 + $0x48] sm:$0xff] }
 0x6a0   :  { %4463 = vmatprep.subr.bf16.mxu1 %v4678_v38  ;;  %v4356_v19 = vpack.c.bf16 %v2641_v44, %v2640_v60 }
 0x6a2   :  { %4357 = vmatpush3.bf16.msra.mxu0 %v4356_v19 }
 0x6a3   :  { %4465 = vmatpush3.bf16.msra.mxu1 %v4353_v18  ;;  %4358 = vmatprep.subr.bf16.mxu0 %v4678_v38 }
 0x6a4   :  { %4466 = vmatprep.subr.bf16.mxu1 %v4678_v38 }
 0x6a6   :  { %4360 = vmatpush3.bf16.msra.mxu0 %v4359_v24 }
 0x6a7   :  { %4468 = vmatpush3.bf16.msra.mxu1 %v4356_v19  ;;  %4361 = vmatprep.subr.bf16.mxu0 %v4678_v38 }
 0x6a8   :  { %4469 = vmatprep.subr.bf16.mxu1 %v4678_v38 }
 0x6aa   :  { %4363 = vmatpush3.bf16.msra.mxu0 %v4362_v28 }
 0x6ab   :  { %4471 = vmatpush3.bf16.msra.mxu1 %v4359_v24  ;;  %3843 = vmatprep.subr.mxu0 %v4677_v7 }
 0x6ac   :  { %4472 = vmatprep.subr.bf16.mxu1 %v4678_v38 }
 0x6ae   :  { %3844 = vmatpush3.msra.mxu0 %v2646_v30 }
 0x6af   :  { %4474 = vmatpush3.bf16.msra.mxu1 %v4362_v28  ;;  %4364 = vmatprep.subr.bf16.mxu0 %v4678_v38 }
 0x6b0   :  { %4016 = vmatprep.subr.mxu1 %v4677_v7 }
 0x6b3   :  { %4017 = vmatpush3.msra.mxu1 %v2646_v30 }
 0x6b4   :  { %4475 = vmatprep.subr.bf16.mxu1 %v4678_v38 }
 0x769   :  { %v2624_v35 = vpop.f32.mrb[26].mxu1 }
 0x76a   :  { %v4490_v46 = vadd.f32 %v2624_v35, %v2203_v31  ;;  %v3814_v47 = vpop.f32.mrb[27].mxu1 }
 0x76c   :  { %v2629_v49 = vmul.f32 0.6666667, %v4490_v46 }
 0x76e   :  { %4645 = vtanh.f32 %v2629_v49 }
 0x778   :  { %v4646_v55 = vpop.eup %4645 }
 0x779   :  { %v2631_v59 = vmul.f32 1.7159, %v4646_v55 }
 0x77b   :  { %3846 = vmatmul.mubr.msk.f32.vlgmr.msra.gmra.mrb[20].mxu0 %vm2648_vm12, %v2631_v59 }
 0x77c   :  { %4366 = vmatpush3.bf16.msra.mxu0 %v6068_v57  ;;  %3870 = vmatprep.mubr.msk.f32.mxu0 %vm4680_vm9, %v4677_v7 }
 0x77d   :  { %4367 = vmatprep.subr.bf16.mxu0 %v4678_v38 }
 0x780   :  { %4369 = vmatpush3.bf16.msra.mxu0 %v6081_v0 }
 0x781   :  { %4370 = vmatprep.subr.bf16.mxu0 %v4678_v38 }
 0x784   :  { %4372 = vmatpush3.bf16.msra.mxu0 %v6091_v5 }
 0x785   :  { %4373 = vmatprep.subr.bf16.mxu0 %v4678_v38 }
 0x788   :  { %4375 = vmatpush3.bf16.msra.mxu0 %v6101_v11 }
 0x789   :  { %4376 = vmatprep.subr.bf16.mxu0 %v4678_v38 }
 0x78c   :  { %4378 = vmatpush3.bf16.msra.mxu0 %v6111_v15 }
 0x78d   :  { %3868 = vmatprep.subr.mxu0 %v4677_v7 }
 0x790   :  { %3869 = vmatpush3.msk.msra.mxu0 %vm958_vm1, %v2735_v17 }
 0x791   :  { %4379 = vmatprep.subr.bf16.mxu0 %v4678_v38 }
 0x84e   :  { %v2718_v18 = vpop.f32.mrb[20].mxu0 }
 0x84f   :  { %v2719_v60 = vadd.f32 %v2718_v18, %v2647_v58  ;;  %v3847_v44 = vpop.f32.mrb[21].mxu0 }
 0x851   :  { %v2722_v19 = vmul.f32 0.6666667, %v2719_v60 }
 0x853   :  { %4647 = vtanh.f32 %v2722_v19 }
 0x85d   :  { %v4648_v21 = vpop.eup %4647 }
 0x85e   :  { %v2724_v22 = vmul.f32 1.7159, %v4648_v21 }
 0x860   :  { %3871 = vmatmul.mubr.msk.f32.vlgmr.msra.gmra.mrb[22].mxu0 %vm1173_vm6, %v2724_v22 }
 0x861   :  { %4381 = vmatpush3.bf16.msra.mxu0 %v5719_v34  ;;  %3893 = vmatprep.mubr.msk.f32.mxu0 %vm4680_vm9, %v4677_v7  ;;  %v2816_v34 = vld [vmem:[#allocation3 + $0x5] sm:$0x1] }
 0x862   :  { %4382 = vmatprep.subr.bf16.mxu0 %v4678_v38 }
 0x865   :  { %4384 = vmatpush3.bf16.msra.mxu0 %v5725_v36  ;;  %v2901_v36 = vld [vmem:[#allocation3 + $0x6] sm:$0x1] }
 0x866   :  { %4385 = vmatprep.subr.bf16.mxu0 %v4678_v38 }
 0x869   :  { %4387 = vmatpush3.bf16.msra.mxu0 %v5735_v42  ;;  %v2986_v42 = vld [vmem:[#allocation3 + $0x7] sm:$0x1] }
 0x86a   :  { %4388 = vmatprep.subr.bf16.mxu0 %v4678_v38 }
 0x86d   :  { %4390 = vmatpush3.bf16.msra.mxu0 %v5747_v50  ;;  %v3071_v50 = vld [vmem:[#allocation3 + $0x8] sm:$0x1] }
 0x86e   :  { %4391 = vmatprep.subr.bf16.mxu0 %v4678_v38 }
 0x871   :  { %4393 = vmatpush3.bf16.msra.mxu0 %v5761_v54  ;;  %v3156_v54 = vld [vmem:[#allocation3 + $0x9] sm:$0x1] }
 0x872   :  { %4394 = vmatprep.subr.bf16.mxu0 %v4678_v38 }
 0x874   :  { %3894 = vmatmul.mubr.msk.f32.vlgmr.msra.gmra.mrb[24].mxu0 %vm2199_vm10, %v2816_v34 }
 0x875   :  { %4396 = vmatpush3.bf16.msra.mxu0 %v5804_v2  ;;  %3916 = vmatprep.mubr.msk.f32.mxu0 %vm4680_vm9, %v4677_v7  ;;  %v2736_v2 = vld [vmem:[%s6246_s14] sm:$0x1] }
 0x876   :  { %4397 = vmatprep.subr.bf16.mxu0 %v4678_v38 }
 0x879   :  { %4399 = vmatpush3.bf16.msra.mxu0 %v5814_v6 }
 0x87a   :  { %4400 = vmatprep.subr.bf16.mxu0 %v4678_v38 }
 0x87d   :  { %4402 = vmatpush3.bf16.msra.mxu0 %v5826_v10 }
 0x87e   :  { %4403 = vmatprep.subr.bf16.mxu0 %v4678_v38 }
 0x881   :  { %4405 = vmatpush3.bf16.msra.mxu0 %v5836_v40 }
 0x882   :  { %4406 = vmatprep.subr.bf16.mxu0 %v4678_v38 }
 0x885   :  { %4408 = vmatpush3.bf16.msra.mxu0 %v5846_v13  ;;  %v2815_v13 = vld [vmem:[%s6242_s10] sm:$0x1] }
 0x886   :  { %4409 = vmatprep.subr.bf16.mxu0 %v4678_v38 }
 0x888   :  { %3917 = vmatmul.mubr.msk.f32.vlgmr.msra.gmra.mrb[24].mxu0 %vm2199_vm10, %v2901_v36 }
 0x889   :  { %4411 = vmatpush3.bf16.msra.mxu0 %v5856_v16  ;;  %3939 = vmatprep.mubr.msk.f32.mxu0 %vm4680_vm9, %v4677_v7 }
 0x88a   :  { %4412 = vmatprep.subr.bf16.mxu0 %v4678_v38 }
 0x88d   :  { %4414 = vmatpush3.bf16.msra.mxu0 %v5867_v20 }
 0x88e   :  { %4415 = vmatprep.subr.bf16.mxu0 %v4678_v38 }
 0x891   :  { %4417 = vmatpush3.bf16.msra.mxu0 %v5879_v23 }
 0x892   :  { %4418 = vmatprep.subr.bf16.mxu0 %v4678_v38 }
 0x895   :  { %4420 = vmatpush3.bf16.msra.mxu0 %v5889_v26 }
 0x896   :  { %4421 = vmatprep.subr.bf16.mxu0 %v4678_v38 }
 0x899   :  { %4423 = vmatpush3.bf16.msra.mxu0 %v5899_v29 }
 0x89a   :  { %4424 = vmatprep.subr.bf16.mxu0 %v4678_v38 }
 0x89c   :  { %3940 = vmatmul.mubr.msk.f32.vlgmr.msra.gmra.mrb[24].mxu0 %vm2199_vm10, %v2986_v42 }
 0x89d   :  { %4426 = vmatpush3.bf16.msra.mxu0 %v5909_v32  ;;  %3962 = vmatprep.mubr.msk.f32.mxu0 %vm4680_vm9, %v4677_v7 }
 0x89e   :  { %4427 = vmatprep.subr.bf16.mxu0 %v4678_v38 }
 0x8a1   :  { %4429 = vmatpush3.bf16.msra.mxu0 %v5920_v39  ;;  %v3346_v39 = vld [vmem:[%s6245_s13 + $0x50] sm:$0xf]  ;;  %s4681_s13 = smov [#allocation4]  }
 0x8a2   :  { %4430 = vmatprep.subr.bf16.mxu0 %v4678_v38  ;;  %s3431_s19 = sshll.u32 %s4681_s13, 4  ;;  %s3432_s19 = int_to_ptr.vmem [resolvable:$true] %s3431_s19 }
 0x8a3   :  { %p4658_p1 = scmp.lt.s32.totalorder %s3432_s19, %s3432_s19 }
 0x8a5   :  { %4432 = vmatpush3.bf16.msra.mxu0 %v5932_v48  ;;  %v3259_v48 = vld [vmem:[%s6244_s12] sm:$0x1]  ;;  %s4653_s12 = scalar_lea.vmem %s3432_s19, 32 }
 0x8a6   :  { %4433 = vmatprep.subr.bf16.mxu0 %v4678_v38  ;;  %p4654_p0 = scmp.ne.s32.totalorder %s3432_s19, %s4653_s12  ;;  %p4659_p2 = scmp.lt.s32.totalorder %s4653_s12, %s4653_s12 }
 0x8a8   :  { %p4660_p3 = por %p4659_p2, %p4658_p1 }
 0x8a9   :  { %4435 = vmatpush3.bf16.msra.mxu0 %v5942_v52 }
 0x8aa   :  { %4436 = vmatprep.subr.bf16.mxu0 %v4678_v38  ;;  %p4661_p4 = pnand %p4660_p3, %p4654_p0 }
 0x8ad   :  { %4438 = vmatpush3.bf16.msra.mxu0 %v5952_v56 }
 0x8ae   :  { %4439 = vmatprep.subr.bf16.mxu0 %v4678_v38 }
 0x8b0   :  { %3963 = vmatmul.mubr.msk.f32.vlgmr.msra.gmra.mrb[24].mxu0 %vm2199_vm10, %v3071_v50 }
 0x8b1   :  { %4441 = vmatpush3.bf16.msra.mxu0 %v5962_v61  ;;  %3985 = vmatprep.mubr.msk.f32.mxu0 %vm4680_vm9, %v4677_v7 }
 0x8b2   :  { %4442 = vmatprep.subr.bf16.mxu0 %v4678_v38 }
 0x8b5   :  { %4444 = vmatpush3.bf16.msra.mxu0 %v5973_v45 }
 0x8b6   :  { %4445 = vmatprep.subr.bf16.mxu0 %v4678_v38 }
 0x8b9   :  { %4447 = vmatpush3.bf16.msra.mxu0 %v5985_v4 }
 0x8ba   :  { %4448 = vmatprep.subr.bf16.mxu0 %v4678_v38 }
 0x8bd   :  { %4450 = vmatpush3.bf16.msra.mxu0 %v5995_v9 }
 0x8be   :  { %4451 = vmatprep.subr.bf16.mxu0 %v4678_v38 }
 0x8c1   :  { %4453 = vmatpush3.bf16.msra.mxu0 %v6005_v43 }
 0x8c4   :  { %3986 = vmatmul.mubr.msk.f32.vlgmr.msra.gmra.mrb[24].mxu0 %vm2199_vm10, %v3156_v54 }
 0x933   :  { %v2809_v6 = vpop.f32.mrb[22].mxu0 }
 0x934   :  { %v2810_v10 = vadd.f32 %v2809_v6, %v2736_v2  ;;  %v3872_v40 = vpop.f32.mrb[23].mxu0 }
 0x936   :  { %2814 = vst.msk [vmem:[#allocation4] sm:$0x1] %vm2813_vm13, %v2810_v10 }
 0x997   :  { %v3236_v16 = vpop.f32.mrb[24].mxu0 }
 0x998   :  { %v4491_v20 = vadd.f32 %v3236_v16, %v2815_v13  ;;  %v3987_v23 = vpop.f32.mrb[25].mxu0 }
 0x99a   :  { %v3241_v26 = vmul.f32 0.6666667, %v4491_v20 }
 0x99c   :  { %4649 = vtanh.f32 %v3241_v26 }
 0x9a6   :  { %v4650_v29 = vpop.eup %4649 }
 0x9a7   :  { %v3243_v32 = vmul.f32 1.7159, %v4650_v29 }
 0x9a9   :  { %4019 = vmatmul.mubr.msk.f32.vlgmr.msra.gmra.mrb[28].mxu1 %vm2648_vm12, %v3243_v32 }
 0x9aa   :  { %4477 = vmatpush3.bf16.msra.mxu1 %v6068_v57  ;;  %4043 = vmatprep.mubr.msk.f32.mxu1 %vm4680_vm9, %v4677_v7 }
 0x9ab   :  { %4478 = vmatprep.subr.bf16.mxu1 %v4678_v38 }
 0x9ae   :  { %4480 = vmatpush3.bf16.msra.mxu1 %v6081_v0 }
 0x9af   :  { %4481 = vmatprep.subr.bf16.mxu1 %v4678_v38 }
 0x9b2   :  { %4483 = vmatpush3.bf16.msra.mxu1 %v6091_v5 }
 0x9b3   :  { %4484 = vmatprep.subr.bf16.mxu1 %v4678_v38 }
 0x9b6   :  { %4486 = vmatpush3.bf16.msra.mxu1 %v6101_v11 }
 0x9b7   :  { %4487 = vmatprep.subr.bf16.mxu1 %v4678_v38 }
 0x9ba   :  { %4489 = vmatpush3.bf16.msra.mxu1 %v6111_v15 }
 0x9bb   :  { %4041 = vmatprep.subr.mxu1 %v4677_v7  ;;  %v3347_v7 = vld [vmem:[%s6246_s14] sm:$0x1] }
 0x9be   :  { %4042 = vmatpush3.msk.msra.mxu1 %vm958_vm1, %v3346_v39 }
 0xa7c   :  { %v3329_v52 = vpop.f32.mrb[28].mxu1 }
 0xa7d   :  { %v3330_v56 = vadd.f32 %v3329_v52, %v3259_v48  ;;  %v4020_v61 = vpop.f32.mrb[29].mxu1 }
 0xa7f   :  { %v3333_v45 = vmul.f32 0.6666667, %v3330_v56 }
 0xa81   :  { %4651 = vtanh.f32 %v3333_v45 }
 0xa8b   :  { %v4652_v38 = vpop.eup %4651 }
 0xa8c   :  { %v3335_v4 = vmul.f32 1.7159, %v4652_v38 }
 0xa8e   :  { %4044 = vmatmul.mubr.msk.f32.vlgmr.msra.gmra.mrb[30].mxu1 %vm1173_vm6, %v3335_v4 }
 0xb61   :  { %v3420_v9 = vpop.f32.mrb[30].mxu1 }
 0xb62   :  { %v3421_v43 = vadd.f32 %v3420_v9, %v3347_v7  ;;  %v4045_v24 = vpop.f32.mrb[31].mxu1 }
 0xb64   :  { %3424 = vst.msk [vmem:[#allocation4 + $0x1] sm:$0x1] %vm2813_vm13, %v3421_v43 }
 0xb65   :  { %4664 = shalt.err (!%p4661_p4)
}
 0xb66   :  { %s4665_s21 = scalar_lea.hbm %s6247_s15, 32 }
 0xb67   :  { %p4666_p5 = scmp.ne.s32.totalorder %s6247_s15, %s4665_s21  ;;  %p4669_p6 = scmp.lt.u32.totalorder %s4665_s21, %s6247_s15 }
 0xb69   :  { %p4671_p7 = pnand %p4669_p6, %p4666_p5 }
 0xb6b   :  { %4674 = shalt.err (!%p4671_p7)
}
 0xb6c   :  { %3434 = dma.vmem_to_hbm [thread:$0]  %s3432_s19, 32, %s6247_s15, [#allocation5]  }
 0xb6d   :  { %4675 = dma.done.wait [#allocation5], 32  }
 0xb6e   :  { %4676 = vsyncadd [#allocation5], 4294967264 }
 0xb6f   :  { %3438 = vsyncpa [#allocation5], 1 }

</bundles_post_ra>
